<compile_context>
chip_gen: v7x
topology: tpu7x:2x2x1
jax: 0.10.0
libtpu: 0.0.40
codegen_flags: <defaults>
</compile_context>

<pallas_src>
import jax
import jax.numpy as jnp
from jax.experimental import pallas as pl
from jax.experimental.pallas import tpu as pltpu

ALPHA = 0.8
# TODO(synk): nb_diff comes from pd.read_csv('good_data_starts_valley.csv').shape[1];
# fixed to 64 here since the script must not read files.
NB_DIFF = 64

# True layer shapes of the PyTorch module; weights stored as [in, out].
DIMS = [(NB_DIFF, 200), (200, 100), (100, 50),
        (50, 100), (100, 200), (200, NB_DIFF)]

LANE = 128


def _round_up(n, m):
    return (n + m - 1) // m * m


# Padded layer shapes (multiples of 128 on both axes).
PAD = [(_round_up(i, LANE), _round_up(o, LANE)) for (i, o) in DIMS]
# -> [(128,256), (256,128), (128,128), (128,128), (128,256), (256,128)]

# Single packed weight slab: layers stacked along rows, columns zero-padded to
# the widest layer (256).  W_OFFS[k] is the row offset of layer k in the slab.
SLAB_COLS = max(po for _, po in PAD)          # 256
W_OFFS = [0]
for _pi, _ in PAD[:-1]:
    W_OFFS.append(W_OFFS[-1] + _pi)
SLAB_ROWS = W_OFFS[-1] + PAD[-1][0]           # 1024

BIAS_ROWS = 8                                 # sublane-aligned bias block
BIAS_COLS = SLAB_COLS                         # 256


def _elu(x, alpha=ALPHA):
    # nn.ELU(alpha): x if x > 0 else alpha*(exp(x)-1).
    # exp() only sees min(x, 0) so the un-taken branch never overflows.
    return jnp.where(x > 0, x, alpha * (jnp.exp(jnp.minimum(x, 0.0)) - 1.0))


def autoencoder_kernel(x_ref, w_ref, b_ref, enc_ref, dec_ref):
    def dense(h, layer):
        pi, po = PAD[layer]
        off = W_OFFS[layer]
        # Static, 128-aligned slice of the packed bf16 weight slab.
        w = w_ref[off:off + pi, :po]
        y = jnp.dot(h.astype(jnp.bfloat16), w,
                    preferred_element_type=jnp.float32)
        return y + b_ref[layer:layer + 1, :po]          # bias add in f32

    x = x_ref[...]                                      # already bf16

    # ---- encoder ----
    h = _elu(dense(x, 0))
    h = _elu(dense(h, 1))
    enc = dense(h, 2)
    enc_ref[...] = enc.astype(enc_ref.dtype)

    # ---- decoder ----
    d = _elu(dense(enc, 3))
    d = _elu(dense(d, 4))
    d = dense(d, 5)
    dec_ref[...] = jax.nn.sigmoid(d).astype(dec_ref.dtype)


def pack_params(params):
    """Pad each f32 [in,out] weight to 128-multiples, cast to bf16, and stack
    all six into one (1024, 256) slab.  Pack the six biases (f32) into one
    (8, 256) block.  One weight DMA + one bias DMA per kernel."""
    w_slab = jnp.zeros((SLAB_ROWS, SLAB_COLS), jnp.float32)
    bias_mat = jnp.zeros((BIAS_ROWS, BIAS_COLS), jnp.float32)
    for idx, ((fi, fo), _pad) in enumerate(zip(DIMS, PAD)):
        w, b = params[2 * idx], params[2 * idx + 1]
        w_slab = w_slab.at[W_OFFS[idx]:W_OFFS[idx] + fi, :fo].set(w)
        bias_mat = bias_mat.at[idx, :fo].set(b)
    return w_slab.astype(jnp.bfloat16), bias_mat


def _choose_tiling(B):
    """Pick (#grid steps g, tile rows tb).  >=2 steps once B is non-trivial so
    the batch axis splits across v7x's two TensorCores; tile rows capped at
    ~1024 to amortize per-step overhead; per-step padding bounded to <16 rows
    (tb is a multiple of 16 so bf16 activation vregs stay dense)."""
    TB_CAP = 1024
    if B <= 16:
        g = 1
    else:
        g = max(2, pl.cdiv(B, TB_CAP))
    tb = _round_up(pl.cdiv(B, g), 16)
    return g, tb


def autoencoder_forward(x, w_slab, bias_mat):
    """x: [B, NB_DIFF] f32.  Returns (encoded [B, 50], decoded [B, NB_DIFF])."""
    B, D = x.shape
    assert D == NB_DIFF
    D_pad = PAD[0][0]      # 128
    LAT_pad = PAD[2][1]    # 128 (latent 50, lane-padded)
    OUT_pad = PAD[5][1]    # 128 (nb_diff, lane-padded)

    g, tb = _choose_tiling(B)
    B_pad = g * tb

    # Zero-pad batch rows / feature columns once, cast to bf16 in the wrapper
    # (halves the per-tile x DMA vs f32).
    xp = jnp.zeros((B_pad, D_pad), jnp.bfloat16).at[:B, :D].set(
        x.astype(jnp.bfloat16))

    out_shape = (
        jax.ShapeDtypeStruct((B_pad, LAT_pad), jnp.float32),
        jax.ShapeDtypeStruct((B_pad, OUT_pad), jnp.float32),
    )
    out_specs = (
        pl.BlockSpec((tb, LAT_pad), lambda i: (i, 0)),   # encoded, batch-tiled
        pl.BlockSpec((tb, OUT_pad), lambda i: (i, 0)),   # decoded, batch-tiled
    )

    def build(single_buffer_consts):
        const_kw = (dict(pipeline_mode=pl.Buffered(1))
                    if single_buffer_consts else {})
        in_specs = [
            pl.BlockSpec((tb, D_pad), lambda i: (i, 0)),                 # x
            pl.BlockSpec(w_slab.shape, lambda i: (0, 0), **const_kw),    # weights
            pl.BlockSpec(bias_mat.shape, lambda i: (0, 0), **const_kw),  # biases
        ]
        return pl.pallas_call(
            autoencoder_kernel,
            grid=(g,),
            in_specs=in_specs,
            out_specs=out_specs,
            out_shape=out_shape,
            compiler_params=pltpu.CompilerParams(
                dimension_semantics=("parallel",),
                vmem_limit_bytes=32 * 1024 * 1024,
            ),
        )

    try:
        enc_p, dec_p = build(True)(xp, w_slab, bias_mat)
    except Exception:
        # Fallback for JAX versions that reject pipeline_mode on pallas_call.
        enc_p, dec_p = build(False)(xp, w_slab, bias_mat)

    # Slice the lane-padded outputs back to the true widths.
    return enc_p[:B, :DIMS[2][1]], dec_p[:B, :NB_DIFF]


def init_params(key, nb_diff=NB_DIFF):
    """Deterministic init mimicking PyTorch's default Linear init
    (uniform +/- 1/sqrt(fan_in)).  Weights stored as [in, out], biases [out]."""
    params = []
    for (fan_in, fan_out) in DIMS:
        key, kw, kb = jax.random.split(key, 3)
        bound = 1.0 / jnp.sqrt(fan_in)
        w = jax.random.uniform(kw, (fan_in, fan_out), jnp.float32, -bound, bound)
        b = jax.random.uniform(kb, (fan_out,), jnp.float32, -bound, bound)
        params += [w, b]
    return tuple(params)


def reference_forward_f32(x, params):
    (w1, b1, w2, b2, w3, b3, w4, b4, w5, b5, w6, b6) = params
    h = _elu(x @ w1 + b1)
    h = _elu(h @ w2 + b2)
    enc = h @ w3 + b3
    d = _elu(enc @ w4 + b4)
    d = _elu(d @ w5 + b5)
    dec = jax.nn.sigmoid(d @ w6 + b6)
    return enc, dec


def reference_forward_bf16(x, params):
    """Pure-JAX reference matching the kernel's precision (bf16 dot inputs,
    f32 accumulation, f32 elementwise math)."""
    def dense(h, w, b):
        return jnp.dot(h.astype(jnp.bfloat16), w.astype(jnp.bfloat16),
                       preferred_element_type=jnp.float32) + b
    (w1, b1, w2, b2, w3, b3, w4, b4, w5, b5, w6, b6) = params
    h = _elu(dense(x, w1, b1))
    h = _elu(dense(h, w2, b2))
    enc = dense(h, w3, b3)
    d = _elu(dense(enc, w4, b4))
    d = _elu(dense(d, w5, b5))
    dec = jax.nn.sigmoid(dense(d, w6, b6))
    return enc, dec


if __name__ == "__main__":
    key = jax.random.PRNGKey(0)
    kx, kp = jax.random.split(key)

    B = 16
    x = jax.random.normal(kx, (B, NB_DIFF), jnp.float32)
    params = init_params(kp)
    w_slab, bias_mat = pack_params(params)

    enc, dec = autoencoder_forward(x, w_slab, bias_mat)
    jax.block_until_ready((enc, dec))
    assert enc.shape == (B, 50) and dec.shape == (B, NB_DIFF)

    # Tight check against a precision-matched (bf16 weight/input) reference.
    enc_bf, dec_bf = reference_forward_bf16(x, params)
    assert jnp.allclose(enc, enc_bf, atol=1e-3, rtol=1e-3)
    assert jnp.allclose(dec, dec_bf, atol=1e-3, rtol=1e-3)

    # Looser check against the full-f32 reference (bf16 rounding budget).
    enc_f32, dec_f32 = reference_forward_f32(x, params)
    assert jnp.allclose(enc, enc_f32, atol=3e-2, rtol=3e-2)
    assert jnp.allclose(dec, dec_f32, atol=3e-2, rtol=3e-2)

    # Also exercise the multi-step (2-tile, batch-padded) grid path.
    B2 = 40
    x2 = jax.random.normal(jax.random.PRNGKey(1), (B2, NB_DIFF), jnp.float32)
    enc2, dec2 = autoencoder_forward(x2, w_slab, bias_mat)
    jax.block_until_ready((enc2, dec2))
    assert enc2.shape == (B2, 50) and dec2.shape == (B2, NB_DIFF)
    enc2_bf, dec2_bf = reference_forward_bf16(x2, params)
    assert jnp.allclose(enc2, enc2_bf, atol=1e-3, rtol=1e-3)
    assert jnp.allclose(dec2, dec2_bf, atol=1e-3, rtol=1e-3)

    print("KERNEL_OK")
</pallas_src>

<mosaic_0001>
module attributes {stable_mosaic.version = 11 : i64} {
  func.func @autoencoder_kernel(%arg0: i32, %arg1: memref<16x128xbf16, #tpu.memory_space<vmem>>, %arg2: memref<1024x256xbf16, #tpu.memory_space<vmem>>, %arg3: memref<8x256xf32, #tpu.memory_space<vmem>>, %arg4: memref<16x128xf32, #tpu.memory_space<vmem>>, %arg5: memref<16x128xf32, #tpu.memory_space<vmem>>) attributes {dimension_semantics = [#tpu.dimension_semantics<parallel>], iteration_bounds = array<i64: 1>, scalar_prefetch = 0 : i64, scratch_operands = 0 : i64, tpu.core_type = #tpu.core_type<tc>, window_params = [{transform_indices = @transform_0, window_bounds = array<i64: 16, 128>}, {pipeline_mode = #tpu.pipeline_mode<synchronous>, transform_indices = @transform_1, window_bounds = array<i64: 1024, 256>}, {pipeline_mode = #tpu.pipeline_mode<synchronous>, transform_indices = @transform_2, window_bounds = array<i64: 8, 256>}, {transform_indices = @transform_3, window_bounds = array<i64: 16, 128>}, {transform_indices = @transform_4, window_bounds = array<i64: 16, 128>}]} {
    %c0 = arith.constant 0 : index
    %c0_0 = arith.constant 0 : index
    %0 = vector.load %arg1[%c0, %c0_0] : memref<16x128xbf16, #tpu.memory_space<vmem>>, vector<16x128xbf16>
    %c0_1 = arith.constant 0 : index
    %c0_2 = arith.constant 0 : index
    %1 = vector.load %arg2[%c0_1, %c0_2] : memref<1024x256xbf16, #tpu.memory_space<vmem>>, vector<128x256xbf16>
    %cst = arith.constant dense<0.000000e+00> : vector<16x256xf32>
    %2 = tpu.matmul %0, %1, %cst {dimension_numbers = #tpu.dot_dimension_numbers<[1], [0], [0], [1], [0, 0, 1, 1], [], []>} : vector<16x128xbf16>, vector<128x256xbf16>, vector<16x256xf32> -> vector<16x256xf32>
    %c0_3 = arith.constant 0 : index
    %c0_4 = arith.constant 0 : index
    %3 = vector.load %arg3[%c0_3, %c0_4] : memref<8x256xf32, #tpu.memory_space<vmem>>, vector<1x256xf32>
    %4 = vector.broadcast %3 : vector<1x256xf32> to vector<16x256xf32>
    %5 = arith.addf %2, %4 : vector<16x256xf32>
    %cst_5 = arith.constant 0.000000e+00 : f32
    %6 = vector.broadcast %cst_5 : f32 to vector<16x256xf32>
    %7 = arith.cmpf ogt, %5, %6 : vector<16x256xf32>
    %cst_6 = arith.constant 0.000000e+00 : f32
    %8 = vector.broadcast %cst_6 : f32 to vector<16x256xf32>
    %9 = arith.minimumf %5, %8 : vector<16x256xf32>
    %10 = math.exp %9 : vector<16x256xf32>
    %cst_7 = arith.constant 1.000000e+00 : f32
    %11 = vector.broadcast %cst_7 : f32 to vector<16x256xf32>
    %12 = arith.subf %10, %11 : vector<16x256xf32>
    %cst_8 = arith.constant 8.000000e-01 : f32
    %13 = vector.broadcast %cst_8 : f32 to vector<16x256xf32>
    %14 = arith.mulf %13, %12 : vector<16x256xf32>
    %15 = arith.select %7, %5, %14 : vector<16x256xi1>, vector<16x256xf32>
    %c128 = arith.constant 128 : index
    %c0_9 = arith.constant 0 : index
    %16 = vector.load %arg2[%c128, %c0_9] : memref<1024x256xbf16, #tpu.memory_space<vmem>>, vector<256x128xbf16>
    %17 = arith.truncf %15 : vector<16x256xf32> to vector<16x256xbf16>
    %cst_10 = arith.constant dense<0.000000e+00> : vector<16x128xf32>
    %18 = tpu.matmul %17, %16, %cst_10 {dimension_numbers = #tpu.dot_dimension_numbers<[1], [0], [0], [1], [0, 0, 1, 1], [], []>} : vector<16x256xbf16>, vector<256x128xbf16>, vector<16x128xf32> -> vector<16x128xf32>
    %c1 = arith.constant 1 : index
    %c0_11 = arith.constant 0 : index
    %19 = vector.load %arg3[%c1, %c0_11] : memref<8x256xf32, #tpu.memory_space<vmem>>, vector<1x128xf32>
    %20 = vector.broadcast %19 : vector<1x128xf32> to vector<16x128xf32>
    %21 = arith.addf %18, %20 : vector<16x128xf32>
    %cst_12 = arith.constant 0.000000e+00 : f32
    %22 = vector.broadcast %cst_12 : f32 to vector<16x128xf32>
    %23 = arith.cmpf ogt, %21, %22 : vector<16x128xf32>
    %cst_13 = arith.constant 0.000000e+00 : f32
    %24 = vector.broadcast %cst_13 : f32 to vector<16x128xf32>
    %25 = arith.minimumf %21, %24 : vector<16x128xf32>
    %26 = math.exp %25 : vector<16x128xf32>
    %cst_14 = arith.constant 1.000000e+00 : f32
    %27 = vector.broadcast %cst_14 : f32 to vector<16x128xf32>
    %28 = arith.subf %26, %27 : vector<16x128xf32>
    %cst_15 = arith.constant 8.000000e-01 : f32
    %29 = vector.broadcast %cst_15 : f32 to vector<16x128xf32>
    %30 = arith.mulf %29, %28 : vector<16x128xf32>
    %31 = arith.select %23, %21, %30 : vector<16x128xi1>, vector<16x128xf32>
    %c384 = arith.constant 384 : index
    %c0_16 = arith.constant 0 : index
    %32 = vector.load %arg2[%c384, %c0_16] : memref<1024x256xbf16, #tpu.memory_space<vmem>>, vector<128x128xbf16>
    %33 = arith.truncf %31 : vector<16x128xf32> to vector<16x128xbf16>
    %cst_17 = arith.constant dense<0.000000e+00> : vector<16x128xf32>
    %34 = tpu.matmul %33, %32, %cst_17 {dimension_numbers = #tpu.dot_dimension_numbers<[1], [0], [0], [1], [0, 0, 1, 1], [], []>} : vector<16x128xbf16>, vector<128x128xbf16>, vector<16x128xf32> -> vector<16x128xf32>
    %c2 = arith.constant 2 : index
    %c0_18 = arith.constant 0 : index
    %35 = vector.load %arg3[%c2, %c0_18] : memref<8x256xf32, #tpu.memory_space<vmem>>, vector<1x128xf32>
    %36 = vector.broadcast %35 : vector<1x128xf32> to vector<16x128xf32>
    %37 = arith.addf %34, %36 : vector<16x128xf32>
    %c0_19 = arith.constant 0 : index
    %c0_20 = arith.constant 0 : index
    %38 = vector.load %arg4[%c0_19, %c0_20] : memref<16x128xf32, #tpu.memory_space<vmem>>, vector<16x128xf32>
    tpu.vector_store %arg4[%c0_19, %c0_20], %37 {strides = array<i32>} : memref<16x128xf32, #tpu.memory_space<vmem>>, vector<16x128xf32>,
    %c512 = arith.constant 512 : index
    %c0_21 = arith.constant 0 : index
    %39 = vector.load %arg2[%c512, %c0_21] : memref<1024x256xbf16, #tpu.memory_space<vmem>>, vector<128x128xbf16>
    %40 = arith.truncf %37 : vector<16x128xf32> to vector<16x128xbf16>
    %cst_22 = arith.constant dense<0.000000e+00> : vector<16x128xf32>
    %41 = tpu.matmul %40, %39, %cst_22 {dimension_numbers = #tpu.dot_dimension_numbers<[1], [0], [0], [1], [0, 0, 1, 1], [], []>} : vector<16x128xbf16>, vector<128x128xbf16>, vector<16x128xf32> -> vector<16x128xf32>
    %c3 = arith.constant 3 : index
    %c0_23 = arith.constant 0 : index
    %42 = vector.load %arg3[%c3, %c0_23] : memref<8x256xf32, #tpu.memory_space<vmem>>, vector<1x128xf32>
    %43 = vector.broadcast %42 : vector<1x128xf32> to vector<16x128xf32>
    %44 = arith.addf %41, %43 : vector<16x128xf32>
    %cst_24 = arith.constant 0.000000e+00 : f32
    %45 = vector.broadcast %cst_24 : f32 to vector<16x128xf32>
    %46 = arith.cmpf ogt, %44, %45 : vector<16x128xf32>
    %cst_25 = arith.constant 0.000000e+00 : f32
    %47 = vector.broadcast %cst_25 : f32 to vector<16x128xf32>
    %48 = arith.minimumf %44, %47 : vector<16x128xf32>
    %49 = math.exp %48 : vector<16x128xf32>
    %cst_26 = arith.constant 1.000000e+00 : f32
    %50 = vector.broadcast %cst_26 : f32 to vector<16x128xf32>
    %51 = arith.subf %49, %50 : vector<16x128xf32>
    %cst_27 = arith.constant 8.000000e-01 : f32
    %52 = vector.broadcast %cst_27 : f32 to vector<16x128xf32>
    %53 = arith.mulf %52, %51 : vector<16x128xf32>
    %54 = arith.select %46, %44, %53 : vector<16x128xi1>, vector<16x128xf32>
    %c640 = arith.constant 640 : index
    %c0_28 = arith.constant 0 : index
    %55 = vector.load %arg2[%c640, %c0_28] : memref<1024x256xbf16, #tpu.memory_space<vmem>>, vector<128x256xbf16>
    %56 = arith.truncf %54 : vector<16x128xf32> to vector<16x128xbf16>
    %cst_29 = arith.constant dense<0.000000e+00> : vector<16x256xf32>
    %57 = tpu.matmul %56, %55, %cst_29 {dimension_numbers = #tpu.dot_dimension_numbers<[1], [0], [0], [1], [0, 0, 1, 1], [], []>} : vector<16x128xbf16>, vector<128x256xbf16>, vector<16x256xf32> -> vector<16x256xf32>
    %c4 = arith.constant 4 : index
    %c0_30 = arith.constant 0 : index
    %58 = vector.load %arg3[%c4, %c0_30] : memref<8x256xf32, #tpu.memory_space<vmem>>, vector<1x256xf32>
    %59 = vector.broadcast %58 : vector<1x256xf32> to vector<16x256xf32>
    %60 = arith.addf %57, %59 : vector<16x256xf32>
    %cst_31 = arith.constant 0.000000e+00 : f32
    %61 = vector.broadcast %cst_31 : f32 to vector<16x256xf32>
    %62 = arith.cmpf ogt, %60, %61 : vector<16x256xf32>
    %cst_32 = arith.constant 0.000000e+00 : f32
    %63 = vector.broadcast %cst_32 : f32 to vector<16x256xf32>
    %64 = arith.minimumf %60, %63 : vector<16x256xf32>
    %65 = math.exp %64 : vector<16x256xf32>
    %cst_33 = arith.constant 1.000000e+00 : f32
    %66 = vector.broadcast %cst_33 : f32 to vector<16x256xf32>
    %67 = arith.subf %65, %66 : vector<16x256xf32>
    %cst_34 = arith.constant 8.000000e-01 : f32
    %68 = vector.broadcast %cst_34 : f32 to vector<16x256xf32>
    %69 = arith.mulf %68, %67 : vector<16x256xf32>
    %70 = arith.select %62, %60, %69 : vector<16x256xi1>, vector<16x256xf32>
    %c768 = arith.constant 768 : index
    %c0_35 = arith.constant 0 : index
    %71 = vector.load %arg2[%c768, %c0_35] : memref<1024x256xbf16, #tpu.memory_space<vmem>>, vector<256x128xbf16>
    %72 = arith.truncf %70 : vector<16x256xf32> to vector<16x256xbf16>
    %cst_36 = arith.constant dense<0.000000e+00> : vector<16x128xf32>
    %73 = tpu.matmul %72, %71, %cst_36 {dimension_numbers = #tpu.dot_dimension_numbers<[1], [0], [0], [1], [0, 0, 1, 1], [], []>} : vector<16x256xbf16>, vector<256x128xbf16>, vector<16x128xf32> -> vector<16x128xf32>
    %c5 = arith.constant 5 : index
    %c0_37 = arith.constant 0 : index
    %74 = vector.load %arg3[%c5, %c0_37] : memref<8x256xf32, #tpu.memory_space<vmem>>, vector<1x128xf32>
    %75 = vector.broadcast %74 : vector<1x128xf32> to vector<16x128xf32>
    %76 = arith.addf %73, %75 : vector<16x128xf32>
    %77 = arith.negf %76 : vector<16x128xf32>
    %78 = math.exp %77 : vector<16x128xf32>
    %cst_38 = arith.constant 1.000000e+00 : f32
    %79 = vector.broadcast %cst_38 : f32 to vector<16x128xf32>
    %80 = arith.addf %79, %78 : vector<16x128xf32>
    %81 = arith.divf %79, %80 : vector<16x128xf32>
    %c0_39 = arith.constant 0 : index
    %c0_40 = arith.constant 0 : index
    %82 = vector.load %arg5[%c0_39, %c0_40] : memref<16x128xf32, #tpu.memory_space<vmem>>, vector<16x128xf32>
    tpu.vector_store %arg5[%c0_39, %c0_40], %81 {strides = array<i32>} : memref<16x128xf32, #tpu.memory_space<vmem>>, vector<16x128xf32>,
    return
  }
  func.func @transform_0(%arg0: i32) -> (i32, i32) {
    %c0_i32 = arith.constant 0 : i32
    %c0_i32_0 = arith.constant 0 : i32
    return %arg0, %c0_i32 : i32, i32
  }
  func.func @transform_1(%arg0: i32) -> (i32, i32) {
    %c0_i32 = arith.constant 0 : i32
    %c0_i32_0 = arith.constant 0 : i32
    %c0_i32_1 = arith.constant 0 : i32
    return %c0_i32, %c0_i32_0 : i32, i32
  }
  func.func @transform_2(%arg0: i32) -> (i32, i32) {
    %c0_i32 = arith.constant 0 : i32
    %c0_i32_0 = arith.constant 0 : i32
    %c0_i32_1 = arith.constant 0 : i32
    return %c0_i32, %c0_i32_0 : i32, i32
  }
  func.func @transform_3(%arg0: i32) -> (i32, i32) {
    %c0_i32 = arith.constant 0 : i32
    %c0_i32_0 = arith.constant 0 : i32
    return %arg0, %c0_i32 : i32, i32
  }
  func.func @transform_4(%arg0: i32) -> (i32, i32) {
    %c0_i32 = arith.constant 0 : i32
    %c0_i32_0 = arith.constant 0 : i32
    return %arg0, %c0_i32 : i32, i32
  }
}

module attributes {stable_mosaic.version = 11 : i64} {
  func.func @autoencoder_kernel(%arg0: i32, %arg1: memref<16x128xbf16, #tpu.memory_space<vmem>>, %arg2: memref<1024x256xbf16, #tpu.memory_space<vmem>>, %arg3: memref<8x256xf32, #tpu.memory_space<vmem>>, %arg4: memref<16x128xf32, #tpu.memory_space<vmem>>, %arg5: memref<16x128xf32, #tpu.memory_space<vmem>>) attributes {dimension_semantics = [#tpu.dimension_semantics<parallel>], iteration_bounds = array<i64: 1>, scalar_prefetch = 0 : i64, scratch_operands = 0 : i64, tpu.core_type = #tpu.core_type<tc>, window_params = [{transform_indices = @transform_0, window_bounds = array<i64: 16, 128>}, {pipeline_mode = #tpu.pipeline_mode<synchronous>, transform_indices = @transform_1, window_bounds = array<i64: 1024, 256>}, {pipeline_mode = #tpu.pipeline_mode<synchronous>, transform_indices = @transform_2, window_bounds = array<i64: 8, 256>}, {transform_indices = @transform_3, window_bounds = array<i64: 16, 128>}, {transform_indices = @transform_4, window_bounds = array<i64: 16, 128>}]} {
    %c0 = arith.constant 0 : index
    %c0_0 = arith.constant 0 : index
    %0 = vector.load %arg1[%c0, %c0_0] : memref<16x128xbf16, #tpu.memory_space<vmem>>, vector<16x128xbf16>
    %c0_1 = arith.constant 0 : index
    %c0_2 = arith.constant 0 : index
    %1 = vector.load %arg2[%c0_1, %c0_2] : memref<1024x256xbf16, #tpu.memory_space<vmem>>, vector<128x256xbf16>
    %cst = arith.constant dense<0.000000e+00> : vector<16x256xf32>
    %2 = tpu.matmul %0, %1, %cst {dimension_numbers = #tpu.dot_dimension_numbers<[1], [0], [0], [1], [0, 0, 1, 1], [], []>} : vector<16x128xbf16>, vector<128x256xbf16>, vector<16x256xf32> -> vector<16x256xf32>
    %c0_3 = arith.constant 0 : index
    %c0_4 = arith.constant 0 : index
    %3 = vector.load %arg3[%c0_3, %c0_4] : memref<8x256xf32, #tpu.memory_space<vmem>>, vector<1x256xf32>
    %4 = vector.broadcast %3 : vector<1x256xf32> to vector<16x256xf32>
    %5 = arith.addf %2, %4 : vector<16x256xf32>
    %cst_5 = arith.constant 0.000000e+00 : f32
    %6 = vector.broadcast %cst_5 : f32 to vector<16x256xf32>
    %7 = arith.cmpf ogt, %5, %6 : vector<16x256xf32>
    %cst_6 = arith.constant 0.000000e+00 : f32
    %8 = vector.broadcast %cst_6 : f32 to vector<16x256xf32>
    %9 = arith.minimumf %5, %8 : vector<16x256xf32>
    %10 = math.exp %9 : vector<16x256xf32>
    %cst_7 = arith.constant 1.000000e+00 : f32
    %11 = vector.broadcast %cst_7 : f32 to vector<16x256xf32>
    %12 = arith.subf %10, %11 : vector<16x256xf32>
    %cst_8 = arith.constant 8.000000e-01 : f32
    %13 = vector.broadcast %cst_8 : f32 to vector<16x256xf32>
    %14 = arith.mulf %13, %12 : vector<16x256xf32>
    %15 = arith.select %7, %5, %14 : vector<16x256xi1>, vector<16x256xf32>
    %c128 = arith.constant 128 : index
    %c0_9 = arith.constant 0 : index
    %16 = vector.load %arg2[%c128, %c0_9] : memref<1024x256xbf16, #tpu.memory_space<vmem>>, vector<256x128xbf16>
    %17 = arith.truncf %15 : vector<16x256xf32> to vector<16x256xbf16>
    %cst_10 = arith.constant dense<0.000000e+00> : vector<16x128xf32>
    %18 = tpu.matmul %17, %16, %cst_10 {dimension_numbers = #tpu.dot_dimension_numbers<[1], [0], [0], [1], [0, 0, 1, 1], [], []>} : vector<16x256xbf16>, vector<256x128xbf16>, vector<16x128xf32> -> vector<16x128xf32>
    %c1 = arith.constant 1 : index
    %c0_11 = arith.constant 0 : index
    %19 = vector.load %arg3[%c1, %c0_11] : memref<8x256xf32, #tpu.memory_space<vmem>>, vector<1x128xf32>
    %20 = vector.broadcast %19 : vector<1x128xf32> to vector<16x128xf32>
    %21 = arith.addf %18, %20 : vector<16x128xf32>
    %cst_12 = arith.constant 0.000000e+00 : f32
    %22 = vector.broadcast %cst_12 : f32 to vector<16x128xf32>
    %23 = arith.cmpf ogt, %21, %22 : vector<16x128xf32>
    %cst_13 = arith.constant 0.000000e+00 : f32
    %24 = vector.broadcast %cst_13 : f32 to vector<16x128xf32>
    %25 = arith.minimumf %21, %24 : vector<16x128xf32>
    %26 = math.exp %25 : vector<16x128xf32>
    %cst_14 = arith.constant 1.000000e+00 : f32
    %27 = vector.broadcast %cst_14 : f32 to vector<16x128xf32>
    %28 = arith.subf %26, %27 : vector<16x128xf32>
    %cst_15 = arith.constant 8.000000e-01 : f32
    %29 = vector.broadcast %cst_15 : f32 to vector<16x128xf32>
    %30 = arith.mulf %29, %28 : vector<16x128xf32>
    %31 = arith.select %23, %21, %30 : vector<16x128xi1>, vector<16x128xf32>
    %c384 = arith.constant 384 : index
    %c0_16 = arith.constant 0 : index
    %32 = vector.load %arg2[%c384, %c0_16] : memref<1024x256xbf16, #tpu.memory_space<vmem>>, vector<128x128xbf16>
    %33 = arith.truncf %31 : vector<16x128xf32> to vector<16x128xbf16>
    %cst_17 = arith.constant dense<0.000000e+00> : vector<16x128xf32>
    %34 = tpu.matmul %33, %32, %cst_17 {dimension_numbers = #tpu.dot_dimension_numbers<[1], [0], [0], [1], [0, 0, 1, 1], [], []>} : vector<16x128xbf16>, vector<128x128xbf16>, vector<16x128xf32> -> vector<16x128xf32>
    %c2 = arith.constant 2 : index
    %c0_18 = arith.constant 0 : index
    %35 = vector.load %arg3[%c2, %c0_18] : memref<8x256xf32, #tpu.memory_space<vmem>>, vector<1x128xf32>
    %36 = vector.broadcast %35 : vector<1x128xf32> to vector<16x128xf32>
    %37 = arith.addf %34, %36 : vector<16x128xf32>
    %c0_19 = arith.constant 0 : index
    %c0_20 = arith.constant 0 : index
    %38 = vector.load %arg4[%c0_19, %c0_20] : memref<16x128xf32, #tpu.memory_space<vmem>>, vector<16x128xf32>
    tpu.vector_store %arg4[%c0_19, %c0_20], %37 {strides = array<i32>} : memref<16x128xf32, #tpu.memory_space<vmem>>, vector<16x128xf32>,
    %c512 = arith.constant 512 : index
    %c0_21 = arith.constant 0 : index
    %39 = vector.load %arg2[%c512, %c0_21] : memref<1024x256xbf16, #tpu.memory_space<vmem>>, vector<128x128xbf16>
    %40 = arith.truncf %37 : vector<16x128xf32> to vector<16x128xbf16>
    %cst_22 = arith.constant dense<0.000000e+00> : vector<16x128xf32>
    %41 = tpu.matmul %40, %39, %cst_22 {dimension_numbers = #tpu.dot_dimension_numbers<[1], [0], [0], [1], [0, 0, 1, 1], [], []>} : vector<16x128xbf16>, vector<128x128xbf16>, vector<16x128xf32> -> vector<16x128xf32>
    %c3 = arith.constant 3 : index
    %c0_23 = arith.constant 0 : index
    %42 = vector.load %arg3[%c3, %c0_23] : memref<8x256xf32, #tpu.memory_space<vmem>>, vector<1x128xf32>
    %43 = vector.broadcast %42 : vector<1x128xf32> to vector<16x128xf32>
    %44 = arith.addf %41, %43 : vector<16x128xf32>
    %cst_24 = arith.constant 0.000000e+00 : f32
    %45 = vector.broadcast %cst_24 : f32 to vector<16x128xf32>
    %46 = arith.cmpf ogt, %44, %45 : vector<16x128xf32>
    %cst_25 = arith.constant 0.000000e+00 : f32
    %47 = vector.broadcast %cst_25 : f32 to vector<16x128xf32>
    %48 = arith.minimumf %44, %47 : vector<16x128xf32>
    %49 = math.exp %48 : vector<16x128xf32>
    %cst_26 = arith.constant 1.000000e+00 : f32
    %50 = vector.broadcast %cst_26 : f32 to vector<16x128xf32>
    %51 = arith.subf %49, %50 : vector<16x128xf32>
    %cst_27 = arith.constant 8.000000e-01 : f32
    %52 = vector.broadcast %cst_27 : f32 to vector<16x128xf32>
    %53 = arith.mulf %52, %51 : vector<16x128xf32>
    %54 = arith.select %46, %44, %53 : vector<16x128xi1>, vector<16x128xf32>
    %c640 = arith.constant 640 : index
    %c0_28 = arith.constant 0 : index
    %55 = vector.load %arg2[%c640, %c0_28] : memref<1024x256xbf16, #tpu.memory_space<vmem>>, vector<128x256xbf16>
    %56 = arith.truncf %54 : vector<16x128xf32> to vector<16x128xbf16>
    %cst_29 = arith.constant dense<0.000000e+00> : vector<16x256xf32>
    %57 = tpu.matmul %56, %55, %cst_29 {dimension_numbers = #tpu.dot_dimension_numbers<[1], [0], [0], [1], [0, 0, 1, 1], [], []>} : vector<16x128xbf16>, vector<128x256xbf16>, vector<16x256xf32> -> vector<16x256xf32>
    %c4 = arith.constant 4 : index
    %c0_30 = arith.constant 0 : index
    %58 = vector.load %arg3[%c4, %c0_30] : memref<8x256xf32, #tpu.memory_space<vmem>>, vector<1x256xf32>
    %59 = vector.broadcast %58 : vector<1x256xf32> to vector<16x256xf32>
    %60 = arith.addf %57, %59 : vector<16x256xf32>
    %cst_31 = arith.constant 0.000000e+00 : f32
    %61 = vector.broadcast %cst_31 : f32 to vector<16x256xf32>
    %62 = arith.cmpf ogt, %60, %61 : vector<16x256xf32>
    %cst_32 = arith.constant 0.000000e+00 : f32
    %63 = vector.broadcast %cst_32 : f32 to vector<16x256xf32>
    %64 = arith.minimumf %60, %63 : vector<16x256xf32>
    %65 = math.exp %64 : vector<16x256xf32>
    %cst_33 = arith.constant 1.000000e+00 : f32
    %66 = vector.broadcast %cst_33 : f32 to vector<16x256xf32>
    %67 = arith.subf %65, %66 : vector<16x256xf32>
    %cst_34 = arith.constant 8.000000e-01 : f32
    %68 = vector.broadcast %cst_34 : f32 to vector<16x256xf32>
    %69 = arith.mulf %68, %67 : vector<16x256xf32>
    %70 = arith.select %62, %60, %69 : vector<16x256xi1>, vector<16x256xf32>
    %c768 = arith.constant 768 : index
    %c0_35 = arith.constant 0 : index
    %71 = vector.load %arg2[%c768, %c0_35] : memref<1024x256xbf16, #tpu.memory_space<vmem>>, vector<256x128xbf16>
    %72 = arith.truncf %70 : vector<16x256xf32> to vector<16x256xbf16>
    %cst_36 = arith.constant dense<0.000000e+00> : vector<16x128xf32>
    %73 = tpu.matmul %72, %71, %cst_36 {dimension_numbers = #tpu.dot_dimension_numbers<[1], [0], [0], [1], [0, 0, 1, 1], [], []>} : vector<16x256xbf16>, vector<256x128xbf16>, vector<16x128xf32> -> vector<16x128xf32>
    %c5 = arith.constant 5 : index
    %c0_37 = arith.constant 0 : index
    %74 = vector.load %arg3[%c5, %c0_37] : memref<8x256xf32, #tpu.memory_space<vmem>>, vector<1x128xf32>
    %75 = vector.broadcast %74 : vector<1x128xf32> to vector<16x128xf32>
    %76 = arith.addf %73, %75 : vector<16x128xf32>
    %77 = arith.negf %76 : vector<16x128xf32>
    %78 = math.exp %77 : vector<16x128xf32>
    %cst_38 = arith.constant 1.000000e+00 : f32
    %79 = vector.broadcast %cst_38 : f32 to vector<16x128xf32>
    %80 = arith.addf %79, %78 : vector<16x128xf32>
    %81 = arith.divf %79, %80 : vector<16x128xf32>
    %c0_39 = arith.constant 0 : index
    %c0_40 = arith.constant 0 : index
    %82 = vector.load %arg5[%c0_39, %c0_40] : memref<16x128xf32, #tpu.memory_space<vmem>>, vector<16x128xf32>
    tpu.vector_store %arg5[%c0_39, %c0_40], %81 {strides = array<i32>} : memref<16x128xf32, #tpu.memory_space<vmem>>, vector<16x128xf32>,
    return
  }
  func.func @transform_0(%arg0: i32) -> (i32, i32) {
    %c0_i32 = arith.constant 0 : i32
    %c0_i32_0 = arith.constant 0 : i32
    return %arg0, %c0_i32 : i32, i32
  }
  func.func @transform_1(%arg0: i32) -> (i32, i32) {
    %c0_i32 = arith.constant 0 : i32
    %c0_i32_0 = arith.constant 0 : i32
    %c0_i32_1 = arith.constant 0 : i32
    return %c0_i32, %c0_i32_0 : i32, i32
  }
  func.func @transform_2(%arg0: i32) -> (i32, i32) {
    %c0_i32 = arith.constant 0 : i32
    %c0_i32_0 = arith.constant 0 : i32
    %c0_i32_1 = arith.constant 0 : i32
    return %c0_i32, %c0_i32_0 : i32, i32
  }
  func.func @transform_3(%arg0: i32) -> (i32, i32) {
    %c0_i32 = arith.constant 0 : i32
    %c0_i32_0 = arith.constant 0 : i32
    return %arg0, %c0_i32 : i32, i32
  }
  func.func @transform_4(%arg0: i32) -> (i32, i32) {
    %c0_i32 = arith.constant 0 : i32
    %c0_i32_0 = arith.constant 0 : i32
    return %arg0, %c0_i32 : i32, i32
  }
}

</mosaic_0001>

<bundles_post_ra>
// kernel: tpu_custom_call.1
= control target key start
LH: loop header
LB: loop body
LE: loop exit
PB: predicated region body
PF: predicated region fallthrough
CT: control target
= control target key end

     0   :  { %10 = vsyncpa [#allocation3], 0  ;;  %s1656_s0 = inlined_call_operand.hbm [shape: bf16[16,128], index: 0, kind: input, shape index: {}]   ;;  %s1657_s1 = inlined_call_operand.hbm [shape: bf16[1024,256], index: 1, kind: input, shape index: {}]   ;;  %s1658_s2 = inlined_call_operand.hbm [shape: f32[8,256], index: 2, kind: input, shape index: {}]   ;;  %s1659_s3 = inlined_call_operand.hbm [shape: f32[16,128], index: 3, kind: output, shape index: {0}]   ;;  %s1660_s4 = inlined_call_operand.hbm [shape: f32[16,128], index: 4, kind: output, shape index: {1}]  }
   0x1   :  { %11 = vsyncpa [#allocation6], 0 }
   0x2   :  { %12 = vsyncpa [#allocation4], 0 }
   0x3   :  { %13 = vsyncpa [#allocation10], 0  ;;  %s1518_s15 = smov [#allocation5]   ;;  %s1400_s19 = scalar_lea.hbm %s1657_s1, 16384 }
   0x4   :  { %s31_s16 = sshll.u32 %s1518_s15, 4  ;;  %p1401_p0 = scmp.ne.s32.totalorder %s1657_s1, %s1400_s19  ;;  %s32_s16 = int_to_ptr.vmem [resolvable:$true] %s31_s16 }
   0x5   :  { %p1404_p1 = scmp.lt.u32.totalorder %s1400_s19, %s1657_s1 }
   0x7   :  { %p1406_p2 = pnand %p1404_p1, %p1401_p0 }
   0x9   :  { %1409 = shalt.err (!%p1406_p2)
}
   0xa   :  { %s1410_s24 = scalar_lea.vmem %s32_s16, 16384  ;;  %p1415_p4 = scmp.lt.s32.totalorder %s32_s16, %s32_s16 }
   0xb   :  { %p1411_p3 = scmp.ne.s32.totalorder %s32_s16, %s1410_s24  ;;  %p1416_p5 = scmp.lt.s32.totalorder %s1410_s24, %s1410_s24 }
   0xd   :  { %p1417_p6 = por %p1416_p5, %p1415_p4 }
   0xf   :  { %p1418_p7 = pnand %p1417_p6, %p1411_p3 }
  0x11   :  { %1421 = shalt.err (!%p1418_p7)
}
  0x12   :  { %s1519_s25 = smov 128   ;;  %s1520_s26 = smov 8  }
  0x13   :  { %37 = dma.hbm_to_vmem [thread:$0]  %s1657_s1, 16384, %s32_s16, [#allocation6], %s1519_s25, %s1519_s25, %s1520_s26  }
  0x14   :  { %s1521_s29 = smov [#allocation2]   ;;  %s1422_s7 = scalar_lea.hbm %s1656_s0, 128 }
  0x15   :  { %s19_s30 = sshll.u32 %s1521_s29, 4  ;;  %p1423_p8 = scmp.ne.s32.totalorder %s1656_s0, %s1422_s7  ;;  %s20_s30 = int_to_ptr.vmem [resolvable:$true] %s19_s30 }
  0x16   :  { %p1426_p9 = scmp.lt.u32.totalorder %s1422_s7, %s1656_s0 }
  0x18   :  { %p1428_p10 = pnand %p1426_p9, %p1423_p8 }
  0x1a   :  { %1431 = shalt.err (!%p1428_p10)
}
  0x1b   :  { %s1432_s12 = scalar_lea.vmem %s20_s30, 128  ;;  %p1437_p12 = scmp.lt.s32.totalorder %s20_s30, %s20_s30 }
  0x1c   :  { %p1433_p11 = scmp.ne.s32.totalorder %s20_s30, %s1432_s12  ;;  %p1438_p13 = scmp.lt.s32.totalorder %s1432_s12, %s1432_s12 }
  0x1e   :  { %p1439_p0 = por %p1438_p13, %p1437_p12 }
  0x20   :  { %p1440_p1 = pnand %p1439_p0, %p1433_p11 }
  0x22   :  { %1443 = shalt.err (!%p1440_p1)
}
  0x23   :  { %s1522_s1 = smov 64   ;;  %s1523_s13 = smov 4  }
  0x24   :  { %25 = dma.hbm_to_vmem [thread:$0]  %s1656_s0, 128, %s20_s30, [#allocation3], %s1522_s1, %s1522_s1, %s1523_s13  }
  0x25   :  { %s1524_s16 = smov [#allocation7]   ;;  %s1444_s20 = scalar_lea.hbm %s1658_s2, 256 }
  0x26   :  { %s44_s17 = sshll.u32 %s1524_s16, 4  ;;  %p1445_p2 = scmp.ne.s32.totalorder %s1658_s2, %s1444_s20  ;;  %s45_s17 = int_to_ptr.vmem [resolvable:$true] %s44_s17 }
  0x27   :  { %p1448_p3 = scmp.lt.u32.totalorder %s1444_s20, %s1658_s2 }
  0x29   :  { %p1450_p4 = pnand %p1448_p3, %p1445_p2 }
  0x2b   :  { %1453 = shalt.err (!%p1450_p4)
}
  0x2c   :  { %s1454_s27 = scalar_lea.vmem %s45_s17, 256  ;;  %p1459_p6 = scmp.lt.s32.totalorder %s45_s17, %s45_s17 }
  0x2d   :  { %p1455_p5 = scmp.ne.s32.totalorder %s45_s17, %s1454_s27  ;;  %p1460_p7 = scmp.lt.s32.totalorder %s1454_s27, %s1454_s27 }
  0x2f   :  { %p1461_p8 = por %p1460_p7, %p1459_p6 }
  0x31   :  { %p1462_p9 = pnand %p1461_p8, %p1455_p5 }
  0x33   :  { %1465 = shalt.err (!%p1462_p9)
}
  0x34   :  { %47 = dma.hbm_to_vmem [thread:$0]  %s1658_s2, 256, %s45_s17, [#allocation6]  }
  0x35   :  { %1510 = dma.done.wait [#allocation3], 128  }
  0x36   :  { %1511 = vsyncadd [#allocation3], 4294967168 }
  0x37   :  { %1512 = dma.done.wait [#allocation6], 16640  }
  0x38   :  { %1513 = vsyncadd [#allocation6], 4294950656  ;;  %v1525_v0 = vmov 0   ;;  %v1271_v1 = vld [vmem:[#allocation5 + $0x4] ss:$8 sps:$4 sm:$0xff]   ;;  %v1295_v19 = vld [vmem:[#allocation2] sm:$0xff]   ;;  %v78_v36 = vlaneseq }
  0x39   :  { %206 = vmatprep.mubr.bf16.mxu0 %v1525_v0  ;;  %v1273_v2 = vld [vmem:[#allocation5] ss:$8 sps:$4 sm:$0xff]   ;;  %174 = vmatprep.subr.bf16.mxu0 %v1271_v1  ;;  %v1274_v3 = vld [vmem:[#allocation5 + $0x14] ss:$8 sps:$4 sm:$0xff]   ;;  %v1276_v4 = vld [vmem:[#allocation5 + $0x10] ss:$8 sps:$4 sm:$0xff]  }
  0x3a   :  { %175 = vmatpush1.bf16.msra.mxu0 %v1273_v2  ;;  %v1277_v5 = vld [vmem:[#allocation5 + $0x24] ss:$8 sps:$4 sm:$0xff]   ;;  %v1279_v6 = vld [vmem:[#allocation5 + $0x20] ss:$8 sps:$4 sm:$0xff]   ;;  %v1280_v7 = vld [vmem:[#allocation5 + $0x34] ss:$8 sps:$4 sm:$0xff]  }
  0x3b   :  { %176 = vmatprep.subr.bf16.mxu0 %v1274_v3  ;;  %v1282_v8 = vld [vmem:[#allocation5 + $0x30] ss:$8 sps:$4 sm:$0xff]   ;;  %v1283_v9 = vld [vmem:[#allocation5 + $0x44] ss:$8 sps:$4 sm:$0xff]   ;;  %v1296_v10 = vld [vmem:[#allocation5 + $0x100] ss:$8 sps:$4 sm:$0xff]  }
  0x3c   :  { %v1285_v11 = vld [vmem:[#allocation5 + $0x40] ss:$8 sps:$4 sm:$0xff]   ;;  %v1286_v13 = vld [vmem:[#allocation5 + $0x54] ss:$8 sps:$4 sm:$0xff]   ;;  %1157 = vmatprep.subr.bf16.mxu1 %v1296_v10  ;;  %v1288_v14 = vld [vmem:[#allocation5 + $0x50] ss:$8 sps:$4 sm:$0xff]  }
  0x3d   :  { %v1297_v12 = vld [vmem:[#allocation5 + $0x80] ss:$8 sps:$4 sm:$0xff]   ;;  %v1289_v15 = vld [vmem:[#allocation5 + $0x64] ss:$8 sps:$4 sm:$0xff]   ;;  %v1292_v17 = vld [vmem:[#allocation5 + $0x74] ss:$8 sps:$4 sm:$0xff]  }
  0x3e   :  { %177 = vmatpush1.bf16.msra.mxu0 %v1276_v4  ;;  %1158 = vmatpush3.bf16.msra.mxu1 %v1297_v12  ;;  %v1291_v16 = vld [vmem:[#allocation5 + $0x60] ss:$8 sps:$4 sm:$0xff]   ;;  %v1294_v18 = vld [vmem:[#allocation5 + $0x70] ss:$8 sps:$4 sm:$0xff]   ;;  %v1526_v35 = vmov 0.0   ;;  %v1598_v37 = vshrl.u32 %v78_v36, 7 }
  0x3f   :  { %178 = vmatprep.subr.bf16.mxu0 %v1277_v5  ;;  %v1298_v20 = vld [vmem:[#allocation5 + $0x110] ss:$8 sps:$4 sm:$0xff]   ;;  %v1300_v22 = vld [vmem:[#allocation5 + $0x120] ss:$8 sps:$4 sm:$0xff]   ;;  %vm1527_vm4 = vmmov 0   ;;  %s1528_s2 = smov [#allocation8]  }
  0x40   :  { %v1299_v21 = vld [vmem:[#allocation5 + $0x90] ss:$8 sps:$4 sm:$0xff]   ;;  %1159 = vmatprep.subr.bf16.mxu1 %v1298_v20  ;;  %v1301_v23 = vld [vmem:[#allocation5 + $0xa0] ss:$8 sps:$4 sm:$0xff]   ;;  %v80_v38 = vsub.s32 0, %v1598_v37  ;;  %v84_v40 = vsub.s32 1, %v1598_v37 }
  0x41   :  { %v1302_v24 = vld [vmem:[#allocation5 + $0x130] ss:$8 sps:$4 sm:$0xff]   ;;  %v1304_v26 = vld [vmem:[#allocation5 + $0x140] ss:$8 sps:$4 sm:$0xff]   ;;  %s1033_s29 = sshll.u32 %s1528_s2, 4  ;;  %s1034_s29 = int_to_ptr.vmem [resolvable:$true] %s1033_s29 }
  0x42   :  { %179 = vmatpush1.bf16.msra.mxu0 %v1279_v6  ;;  %1160 = vmatpush3.bf16.msra.mxu1 %v1299_v21  ;;  %v1303_v25 = vld [vmem:[#allocation5 + $0xb0] ss:$8 sps:$4 sm:$0xff]   ;;  %v1305_v27 = vld [vmem:[#allocation5 + $0xc0] ss:$8 sps:$4 sm:$0xff]   ;;  %s1466_s30 = scalar_lea.vmem %s1034_s29, 256  ;;  %p1471_p11 = scmp.lt.s32.totalorder %s1034_s29, %s1034_s29 }
  0x43   :  { %180 = vmatprep.subr.bf16.mxu0 %v1280_v7  ;;  %1161 = vmatprep.subr.bf16.mxu1 %v1300_v22  ;;  %v1306_v28 = vld [vmem:[#allocation5 + $0x150] ss:$8 sps:$4 sm:$0xff]   ;;  %v1308_v30 = vld [vmem:[#allocation5 + $0x160] ss:$8 sps:$4 sm:$0xff]   ;;  %p1467_p10 = scmp.ne.s32.totalorder %s1034_s29, %s1466_s30  ;;  %p1472_p12 = scmp.lt.s32.totalorder %s1466_s30, %s1466_s30 }
  0x44   :  { %v1307_v29 = vld [vmem:[#allocation5 + $0xd0] ss:$8 sps:$4 sm:$0xff]   ;;  %v1309_v31 = vld [vmem:[#allocation5 + $0xe0] ss:$8 sps:$4 sm:$0xff]  }
  0x45   :  { %v1310_v32 = vld [vmem:[#allocation5 + $0x170] ss:$8 sps:$4 sm:$0xff]   ;;  %v1312_v34 = vld [vmem:[#allocation5 + $0x180] ss:$8 sps:$4 sm:$0xff]   ;;  %p1473_p13 = por %p1472_p12, %p1471_p11 }
  0x46   :  { %181 = vmatpush1.bf16.msra.mxu0 %v1282_v8  ;;  %1162 = vmatpush3.bf16.msra.mxu1 %v1301_v23  ;;  %v1311_v33 = vld [vmem:[#allocation5 + $0xf0] ss:$8 sps:$4 sm:$0xff]   ;;  %v76_v39 = vld [vmem:[#allocation7] ss:$8 sm:$0x3] }
  0x47   :  { %182 = vmatprep.subr.bf16.mxu0 %v1283_v9  ;;  %1163 = vmatprep.subr.bf16.mxu1 %v1302_v24  ;;  %v81_v41 = vrot.slane %v76_v39, %v80_v38  ;;  %v85_v42 = vrot.slane %v76_v39, %v84_v40  ;;  %v1319_v20 = vld [vmem:[#allocation5 + $0x1f0] ss:$8 sps:$4 sm:$0xff]   ;;  %v1320_v21 = vld [vmem:[#allocation5 + $0x200] ss:$8 sps:$4 sm:$0xff]   ;;  %p1474_p0 = pnand %p1473_p13, %p1467_p10 }
  0x48   :  { %v1321_v22 = vld [vmem:[#allocation5 + $0x210] ss:$8 sps:$4 sm:$0xff]   ;;  %v1322_v23 = vld [vmem:[#allocation5 + $0x220] ss:$8 sps:$4 sm:$0xff]  }
  0x49   :  { %v1323_v24 = vld [vmem:[#allocation5 + $0x230] ss:$8 sps:$4 sm:$0xff]  }
  0x4a   :  { %183 = vmatpush1.bf16.msra.mxu0 %v1285_v11  ;;  %1164 = vmatpush3.bf16.msra.mxu1 %v1303_v25  ;;  %v1324_v25 = vld [vmem:[#allocation5 + $0x240] ss:$8 sps:$4 sm:$0xff]  }
  0x4b   :  { %184 = vmatprep.subr.bf16.mxu0 %v1286_v13  ;;  %1165 = vmatprep.subr.bf16.mxu1 %v1304_v26  ;;  %v1325_v26 = vld [vmem:[#allocation5 + $0x250] ss:$8 sps:$4 sm:$0xff]  }
  0x4e   :  { %185 = vmatpush1.bf16.msra.mxu0 %v1288_v14  ;;  %1166 = vmatpush3.bf16.msra.mxu1 %v1305_v27  ;;  %v1313_v14 = vld [vmem:[#allocation5 + $0x190] ss:$8 sps:$4 sm:$0xff]  }
  0x4f   :  { %186 = vmatprep.subr.bf16.mxu0 %v1289_v15  ;;  %1167 = vmatprep.subr.bf16.mxu1 %v1306_v28  ;;  %v1314_v15 = vld [vmem:[#allocation5 + $0x1a0] ss:$8 sps:$4 sm:$0xff]  }
  0x50   :  { %v279_v28 = vld [vmem:[#allocation7 + $0x1] ss:$0 sm:$0xff] }
  0x52   :  { %187 = vmatpush1.bf16.msra.mxu0 %v1291_v16  ;;  %1168 = vmatpush3.bf16.msra.mxu1 %v1307_v29  ;;  %v1315_v16 = vld [vmem:[#allocation5 + $0x1b0] ss:$8 sps:$4 sm:$0xff]  }
  0x53   :  { %188 = vmatprep.subr.bf16.mxu0 %v1292_v17  ;;  %1169 = vmatprep.subr.bf16.mxu1 %v1308_v30  ;;  %v1316_v17 = vld [vmem:[#allocation5 + $0x1c0] ss:$8 sps:$4 sm:$0xff]  }
  0x56   :  { %189 = vmatpush1.bf16.msra.mxu0 %v1294_v18  ;;  %1170 = vmatpush3.bf16.msra.mxu1 %v1309_v31  ;;  %v1317_v18 = vld [vmem:[#allocation5 + $0x1d0] ss:$8 sps:$4 sm:$0xff]  }
  0x57   :  { %1171 = vmatprep.subr.bf16.mxu1 %v1310_v32  ;;  %1219 = vmatprep.subr.bf16.mxu0 %v1526_v35 }
  0x59   :  { %207 = vmatmul.mubr.bf16.vlgmr.msra.gmra.mrb[0].mxu0 %v1295_v19  ;;  %v1318_v19 = vld [vmem:[#allocation5 + $0x1e0] ss:$8 sps:$4 sm:$0xff]  }
  0x5a   :  { %1172 = vmatpush3.bf16.msra.mxu1 %v1311_v33  ;;  %1220 = vmatpush3.bf16.msra.mxu0 %v1312_v34 }
  0x5b   :  { %1239 = vmatprep.subr.bf16.mxu1 %v1526_v35  ;;  %1221 = vmatprep.subr.bf16.mxu0 %v1526_v35 }
  0x5c   :  { %1235 = vmatprep.mubr.msk.bf16.mxu0 %vm1527_vm4, %v1526_v35 }
  0x5e   :  { %1222 = vmatpush3.bf16.msra.mxu0 %v1313_v14  ;;  %v1352_v14 = vld [vmem:[#allocation5 + $0x380] ss:$8 sps:$4 sm:$0xff]  }
  0x5f   :  { %1223 = vmatprep.subr.bf16.mxu0 %v1526_v35 }
  0x62   :  { %1224 = vmatpush3.bf16.msra.mxu0 %v1314_v15  ;;  %v1353_v15 = vld [vmem:[#allocation5 + $0x300] ss:$8 sps:$4 sm:$0xff]  }
  0x63   :  { %1225 = vmatprep.subr.bf16.mxu0 %v1526_v35 }
  0x66   :  { %1226 = vmatpush3.bf16.msra.mxu0 %v1315_v16  ;;  %v557_v16 = vld [vmem:[#allocation7 + $0x3] ss:$0 sm:$0xff] }
  0x67   :  { %1227 = vmatprep.subr.bf16.mxu0 %v1526_v35 }
  0x6a   :  { %1228 = vmatpush3.bf16.msra.mxu0 %v1316_v17 }
  0x6b   :  { %1229 = vmatprep.subr.bf16.mxu0 %v1526_v35 }
  0x6e   :  { %1230 = vmatpush3.bf16.msra.mxu0 %v1317_v18 }
  0x6f   :  { %1231 = vmatprep.subr.bf16.mxu0 %v1526_v35 }
  0x72   :  { %1232 = vmatpush3.bf16.msra.mxu0 %v1318_v19 }
  0x73   :  { %1233 = vmatprep.subr.bf16.mxu0 %v1526_v35 }
  0x76   :  { %1234 = vmatpush3.bf16.msra.mxu0 %v1319_v20 }
 0x12c   :  { %v208_v43 = vpop.f32.mrb[0].mxu0 }
 0x12d   :  { %v209_v44 = vadd.f32 %v208_v43, %v81_v41  ;;  %v210_v45 = vpop.f32.mrb[1].mxu0 }
 0x12e   :  { %v211_v46 = vadd.f32 %v210_v45, %v85_v42  ;;  %v212_v47 = vpop.f32.mrb[2].mxu0 }
 0x12f   :  { %v221_v48 = vmin.f32 %v209_v44, 0.0  ;;  %v213_v49 = vadd.f32 %v212_v47, %v81_v41  ;;  %v214_v50 = vpop.f32.mrb[3].mxu0  ;;  %vm217_vm0 = vcmp.gt.f32.partialorder %v209_v44, 0.0 }
 0x130   :  { %v222_v51 = vmin.f32 %v211_v46, 0.0  ;;  %v215_v52 = vadd.f32 %v214_v50, %v85_v42  ;;  %vm218_vm2 = vcmp.gt.f32.partialorder %v211_v46, 0.0 }
 0x131   :  { %v225_v53 = vmul.f32 1.442695, %v221_v48  ;;  %v223_v54 = vmin.f32 %v213_v49, 0.0  ;;  %vm219_vm1 = vcmp.gt.f32.partialorder %v213_v49, 0.0 }
 0x132   :  { %v227_v55 = vmul.f32 1.442695, %v222_v51  ;;  %v224_v56 = vmin.f32 %v215_v52, 0.0  ;;  %vm220_vm3 = vcmp.gt.f32.partialorder %v215_v52, 0.0 }
 0x133   :  { %1368 = vpow2.f32 %v225_v53  ;;  %v229_v57 = vmul.f32 1.442695, %v223_v54  ;;  %v1326_v53 = vld [vmem:[#allocation5 + $0x260] ss:$8 sps:$4 sm:$0xff]   ;;  %v1327_v54 = vld [vmem:[#allocation5 + $0x270] ss:$8 sps:$4 sm:$0xff]  }
 0x134   :  { %1370 = vpow2.f32 %v227_v55  ;;  %v231_v58 = vmul.f32 1.442695, %v224_v56  ;;  %v1328_v55 = vld [vmem:[#allocation5 + $0x280] ss:$8 sps:$4 sm:$0xff]   ;;  %v1330_v56 = vld [vmem:[#allocation5 + $0x284] ss:$8 sps:$4 sm:$0xff]  }
 0x135   :  { %1372 = vpow2.f32 %v229_v57  ;;  %v1333_v57 = vld [vmem:[#allocation5 + $0x294] ss:$8 sps:$4 sm:$0xff]   ;;  %771 = vmatprep.subr.bf16.mxu0 %v1330_v56 }
 0x136   :  { %1374 = vpow2.f32 %v231_v58  ;;  %v1331_v58 = vld [vmem:[#allocation5 + $0x290] ss:$8 sps:$4 sm:$0xff]  }
 0x13d   :  { %v1369_v59 = vpop.eup %1368 }
 0x13e   :  { %v1371_v60 = vpop.eup %1370  ;;  %v1079_v61 = vadd.f32 -1.0, %v1369_v59  ;;  %v448_v59 = vld [vmem:[#allocation7 + $0x2] ss:$0 sm:$0xff] }
 0x13f   :  { %v1373_v62 = vpop.eup %1372  ;;  %v1080_v63 = vadd.f32 -1.0, %v1371_v60 }
 0x140   :  { %v1375_v1 = vpop.eup %1374  ;;  %v237_v2 = vmul.f32 0.8, %v1079_v61  ;;  %v1081_v3 = vadd.f32 -1.0, %v1373_v62 }
 0x141   :  { %v1082_v4 = vadd.f32 -1.0, %v1375_v1  ;;  %v238_v5 = vmul.f32 0.8, %v1080_v63 }
 0x142   :  { %v239_v6 = vmul.f32 0.8, %v1081_v3  ;;  %v241_v8 = vsel %vm217_vm0, %v209_v44, %v237_v2  ;;  %v1336_v2 = vld [vmem:[#allocation5 + $0x2a4] ss:$8 sps:$4 sm:$0xff]   ;;  %v1334_v3 = vld [vmem:[#allocation5 + $0x2a0] ss:$8 sps:$4 sm:$0xff]  }
 0x143   :  { %v240_v7 = vmul.f32 0.8, %v1082_v4  ;;  %v242_v10 = vsel %vm218_vm2, %v211_v46, %v238_v5  ;;  %v1339_v4 = vld [vmem:[#allocation5 + $0x2b4] ss:$8 sps:$4 sm:$0xff]   ;;  %v1337_v5 = vld [vmem:[#allocation5 + $0x2b0] ss:$8 sps:$4 sm:$0xff]  }
 0x144   :  { %v243_v9 = vsel %vm219_vm1, %v213_v49, %v239_v6  ;;  %v1342_v6 = vld [vmem:[#allocation5 + $0x2c4] ss:$8 sps:$4 sm:$0xff]  }
 0x145   :  { %v244_v11 = vsel %vm220_vm3, %v215_v52, %v240_v7  ;;  %v277_v12 = vpack.c.bf16 %v243_v9, %v241_v8  ;;  %v1340_v7 = vld [vmem:[#allocation5 + $0x2c0] ss:$8 sps:$4 sm:$0xff]   ;;  %v1345_v8 = vld [vmem:[#allocation5 + $0x2d4] ss:$8 sps:$4 sm:$0xff]   ;;  %v1343_v9 = vld [vmem:[#allocation5 + $0x2d0] ss:$8 sps:$4 sm:$0xff]  }
 0x146   :  { %v278_v13 = vpack.c.bf16 %v244_v11, %v242_v10  ;;  %v1348_v10 = vld [vmem:[#allocation5 + $0x2e4] ss:$8 sps:$4 sm:$0xff]   ;;  %v1346_v11 = vld [vmem:[#allocation5 + $0x2e0] ss:$8 sps:$4 sm:$0xff]  }
 0x148   :  { %408 = vmatprep.mubr.bf16.mxu1 %v278_v13  ;;  %v1349_v13 = vld [vmem:[#allocation5 + $0x2f0] ss:$8 sps:$4 sm:$0xff]  }
 0x149   :  { %409 = vmatmul.mubr.bf16.vlgmr.msra.gmra.mrb[0].mxu1 %v277_v12  ;;  %v1351_v12 = vld [vmem:[#allocation5 + $0x2f4] ss:$8 sps:$4 sm:$0xff]  }
 0x14a   :  { %1255 = vmatprep.mubr.msk.bf16.mxu1 %vm1527_vm4, %v1526_v35  ;;  %1240 = vmatpush3.bf16.msra.mxu1 %v1320_v21 }
 0x14b   :  { %1241 = vmatprep.subr.bf16.mxu1 %v1526_v35 }
 0x14e   :  { %1242 = vmatpush3.bf16.msra.mxu1 %v1321_v22 }
 0x14f   :  { %1243 = vmatprep.subr.bf16.mxu1 %v1526_v35 }
 0x152   :  { %1244 = vmatpush3.bf16.msra.mxu1 %v1322_v23 }
 0x153   :  { %1245 = vmatprep.subr.bf16.mxu1 %v1526_v35 }
 0x156   :  { %1246 = vmatpush3.bf16.msra.mxu1 %v1323_v24 }
 0x157   :  { %1247 = vmatprep.subr.bf16.mxu1 %v1526_v35 }
 0x15a   :  { %1248 = vmatpush3.bf16.msra.mxu1 %v1324_v25 }
 0x15b   :  { %1249 = vmatprep.subr.bf16.mxu1 %v1526_v35 }
 0x15e   :  { %1250 = vmatpush3.bf16.msra.mxu1 %v1325_v26 }
 0x15f   :  { %1251 = vmatprep.subr.bf16.mxu1 %v1526_v35 }
 0x162   :  { %1252 = vmatpush3.bf16.msra.mxu1 %v1326_v53  ;;  %v1367_v53 = vld [vmem:[#allocation5 + $0x370] ss:$8 sps:$4 sm:$0xff]  }
 0x163   :  { %1253 = vmatprep.subr.bf16.mxu1 %v1526_v35 }
 0x166   :  { %1254 = vmatpush3.bf16.msra.mxu1 %v1327_v54  ;;  %v679_v54 = vld [vmem:[#allocation7 + $0x4] ss:$8 sm:$0x3] }
 0x167   :  { %1197 = vmatprep.subr.bf16.mxu1 %v1352_v14  ;;  %v688_v56 = vrot.slane %v679_v54, %v84_v40 }
 0x21c   :  { %v1173_v27 = vpop.f32.mrb[0].mxu1 }
 0x21d   :  { %v1174_v29 = vpop.f32.mrb[1].mxu1 }
 0x21e   :  { %v1175_v30 = vadd.f32 %v1174_v29, %v1173_v27  ;;  %v1176_v31 = vpop.f32.mrb[2].mxu1 }
 0x21f   :  { %v1177_v32 = vpop.f32.mrb[3].mxu1 }
 0x220   :  { %v411_v33 = vadd.f32 %v1175_v30, %v279_v28  ;;  %v1178_v34 = vadd.f32 %v1177_v32, %v1176_v31 }
 0x222   :  { %v419_v36 = vmin.f32 %v411_v33, 0.0  ;;  %v414_v39 = vadd.f32 %v1178_v34, %v279_v28  ;;  %vm417_vm5 = vcmp.gt.f32.partialorder %v411_v33, 0.0 }
 0x224   :  { %v421_v41 = vmul.f32 1.442695, %v419_v36  ;;  %v420_v42 = vmin.f32 %v414_v39, 0.0  ;;  %vm418_vm6 = vcmp.gt.f32.partialorder %v414_v39, 0.0 }
 0x226   :  { %1376 = vpow2.f32 %v421_v41  ;;  %v423_v43 = vmul.f32 1.442695, %v420_v42  ;;  %v1355_v41 = vld [vmem:[#allocation5 + $0x310] ss:$8 sps:$4 sm:$0xff]   ;;  %v1356_v42 = vld [vmem:[#allocation5 + $0x3a0] ss:$8 sps:$4 sm:$0xff]  }
 0x228   :  { %1378 = vpow2.f32 %v423_v43  ;;  %v1357_v43 = vld [vmem:[#allocation5 + $0x320] ss:$8 sps:$4 sm:$0xff]  }
 0x230   :  { %v1377_v44 = vpop.eup %1376 }
 0x231   :  { %v1099_v45 = vadd.f32 -1.0, %v1377_v44  ;;  %v1358_v44 = vld [vmem:[#allocation5 + $0x3b0] ss:$8 sps:$4 sm:$0xff]  }
 0x232   :  { %v1379_v46 = vpop.eup %1378 }
 0x233   :  { %v427_v47 = vmul.f32 0.8, %v1099_v45  ;;  %v1100_v48 = vadd.f32 -1.0, %v1379_v46  ;;  %v1359_v45 = vld [vmem:[#allocation5 + $0x330] ss:$8 sps:$4 sm:$0xff]  }
 0x234   :  { %v1360_v46 = vld [vmem:[#allocation5 + $0x3c0] ss:$8 sps:$4 sm:$0xff]  }
 0x235   :  { %v428_v49 = vmul.f32 0.8, %v1100_v48  ;;  %v429_v50 = vsel %vm417_vm5, %v411_v33, %v427_v47  ;;  %v1361_v47 = vld [vmem:[#allocation5 + $0x340] ss:$8 sps:$4 sm:$0xff]   ;;  %v1362_v48 = vld [vmem:[#allocation5 + $0x3d0] ss:$8 sps:$4 sm:$0xff]  }
 0x237   :  { %v430_v51 = vsel %vm418_vm6, %v414_v39, %v428_v49  ;;  %v1354_v39 = vld [vmem:[#allocation5 + $0x390] ss:$8 sps:$4 sm:$0xff]  }
 0x238   :  { %v447_v52 = vpack.c.bf16 %v430_v51, %v429_v50  ;;  %v1363_v49 = vld [vmem:[#allocation5 + $0x350] ss:$8 sps:$4 sm:$0xff]   ;;  %v1364_v50 = vld [vmem:[#allocation5 + $0x3e0] ss:$8 sps:$4 sm:$0xff]  }
 0x239   :  { %v1365_v51 = vld [vmem:[#allocation5 + $0x360] ss:$8 sps:$4 sm:$0xff]  }
 0x23a   :  { %1236 = vmatmul.mubr.bf16.vlgmr.msra.gmra.mrb[4].mxu0 %v447_v52  ;;  %v1366_v52 = vld [vmem:[#allocation5 + $0x3f0] ss:$8 sps:$4 sm:$0xff]  }
 0x23b   :  { %803 = vmatprep.mubr.bf16.mxu0 %v1525_v0  ;;  %772 = vmatpush1.bf16.msra.mxu0 %v1328_v55  ;;  %v684_v55 = vrot.slane %v679_v54, %v80_v38 }
 0x23c   :  { %773 = vmatprep.subr.bf16.mxu0 %v1333_v57 }
 0x23f   :  { %774 = vmatpush1.bf16.msra.mxu0 %v1331_v58 }
 0x240   :  { %775 = vmatprep.subr.bf16.mxu0 %v1336_v2 }
 0x243   :  { %776 = vmatpush1.bf16.msra.mxu0 %v1334_v3 }
 0x244   :  { %777 = vmatprep.subr.bf16.mxu0 %v1339_v4 }
 0x247   :  { %778 = vmatpush1.bf16.msra.mxu0 %v1337_v5 }
 0x248   :  { %779 = vmatprep.subr.bf16.mxu0 %v1342_v6 }
 0x24b   :  { %780 = vmatpush1.bf16.msra.mxu0 %v1340_v7 }
 0x24c   :  { %781 = vmatprep.subr.bf16.mxu0 %v1345_v8 }
 0x24f   :  { %782 = vmatpush1.bf16.msra.mxu0 %v1343_v9 }
 0x250   :  { %783 = vmatprep.subr.bf16.mxu0 %v1348_v10 }
 0x253   :  { %784 = vmatpush1.bf16.msra.mxu0 %v1346_v11 }
 0x254   :  { %785 = vmatprep.subr.bf16.mxu0 %v1351_v12 }
 0x257   :  { %786 = vmatpush1.bf16.msra.mxu0 %v1349_v13 }
 0x30d   :  { %v531_v60 = vpop.f32.mrb[4].mxu0 }
 0x30e   :  { %v532_v61 = vadd.f32 %v531_v60, %v448_v59  ;;  %v1237_v62 = vpop.f32.mrb[5].mxu0 }
 0x30f   :  { %v534_v63 = vpop.f32.mrb[6].mxu0 }
 0x310   :  { %538 = vst [vmem:[#allocation8] sm:$0xff] %v532_v61  ;;  %v535_v0 = vadd.f32 %v534_v63, %v448_v59  ;;  %v1238_v1 = vpop.f32.mrb[7].mxu0 }
 0x312   :  { %539 = vst [vmem:[#allocation8 + $0x8] sm:$0xff] %v535_v0  ;;  %v556_v35 = vpack.c.bf16 %v535_v0, %v532_v61 }
 0x314   :  { %1256 = vmatmul.mubr.bf16.vlgmr.msra.gmra.mrb[4].mxu1 %v556_v35 }
 0x315   :  { %1198 = vmatpush3.bf16.msra.mxu1 %v1353_v15 }
 0x316   :  { %1199 = vmatprep.subr.bf16.mxu1 %v1354_v39 }
 0x319   :  { %1200 = vmatpush3.bf16.msra.mxu1 %v1355_v41 }
 0x31a   :  { %1201 = vmatprep.subr.bf16.mxu1 %v1356_v42 }
 0x31d   :  { %1202 = vmatpush3.bf16.msra.mxu1 %v1357_v43 }
 0x31e   :  { %1203 = vmatprep.subr.bf16.mxu1 %v1358_v44 }
 0x321   :  { %1204 = vmatpush3.bf16.msra.mxu1 %v1359_v45 }
 0x322   :  { %1205 = vmatprep.subr.bf16.mxu1 %v1360_v46 }
 0x325   :  { %1206 = vmatpush3.bf16.msra.mxu1 %v1361_v47 }
 0x326   :  { %1207 = vmatprep.subr.bf16.mxu1 %v1362_v48 }
 0x329   :  { %1208 = vmatpush3.bf16.msra.mxu1 %v1363_v49 }
 0x32a   :  { %1209 = vmatprep.subr.bf16.mxu1 %v1364_v50 }
 0x32d   :  { %1210 = vmatpush3.bf16.msra.mxu1 %v1365_v51 }
 0x32e   :  { %1211 = vmatprep.subr.bf16.mxu1 %v1366_v52 }
 0x331   :  { %1212 = vmatpush3.bf16.msra.mxu1 %v1367_v53 }
 0x3e7   :  { %v640_v17 = vpop.f32.mrb[4].mxu1 }
 0x3e8   :  { %v641_v18 = vadd.f32 %v640_v17, %v557_v16  ;;  %v1257_v19 = vpop.f32.mrb[5].mxu1 }
 0x3e9   :  { %v643_v20 = vpop.f32.mrb[6].mxu1 }
 0x3ea   :  { %v649_v21 = vmin.f32 %v641_v18, 0.0  ;;  %v644_v22 = vadd.f32 %v643_v20, %v557_v16  ;;  %v1258_v23 = vpop.f32.mrb[7].mxu1  ;;  %vm647_vm7 = vcmp.gt.f32.partialorder %v641_v18, 0.0 }
 0x3ec   :  { %v651_v24 = vmul.f32 1.442695, %v649_v21  ;;  %v650_v25 = vmin.f32 %v644_v22, 0.0  ;;  %vm648_vm8 = vcmp.gt.f32.partialorder %v644_v22, 0.0 }
 0x3ee   :  { %1380 = vpow2.f32 %v651_v24  ;;  %v653_v26 = vmul.f32 1.442695, %v650_v25 }
 0x3f0   :  { %1382 = vpow2.f32 %v653_v26 }
 0x3f8   :  { %v1381_v27 = vpop.eup %1380 }
 0x3f9   :  { %v1117_v28 = vadd.f32 -1.0, %v1381_v27 }
 0x3fa   :  { %v1383_v29 = vpop.eup %1382 }
 0x3fb   :  { %v657_v30 = vmul.f32 0.8, %v1117_v28  ;;  %v1118_v31 = vadd.f32 -1.0, %v1383_v29 }
 0x3fd   :  { %v658_v32 = vmul.f32 0.8, %v1118_v31  ;;  %v659_v33 = vsel %vm647_vm7, %v641_v18, %v657_v30 }
 0x3ff   :  { %v660_v34 = vsel %vm648_vm8, %v644_v22, %v658_v32 }
 0x400   :  { %v677_v36 = vpack.c.bf16 %v660_v34, %v659_v33 }
 0x402   :  { %804 = vmatmul.mubr.bf16.vlgmr.msra.gmra.mrb[8].mxu0 %v677_v36 }
 0x4d5   :  { %v805_v57 = vpop.f32.mrb[8].mxu0 }
 0x4d6   :  { %v806_v58 = vadd.f32 %v805_v57, %v684_v55  ;;  %v807_v59 = vpop.f32.mrb[9].mxu0 }
 0x4d7   :  { %v808_v60 = vadd.f32 %v807_v59, %v688_v56  ;;  %v809_v61 = vpop.f32.mrb[10].mxu0 }
 0x4d8   :  { %v818_v62 = vmin.f32 %v806_v58, 0.0  ;;  %v810_v63 = vadd.f32 %v809_v61, %v684_v55  ;;  %v811_v0 = vpop.f32.mrb[11].mxu0  ;;  %vm814_vm9 = vcmp.gt.f32.partialorder %v806_v58, 0.0 }
 0x4d9   :  { %v819_v1 = vmin.f32 %v808_v60, 0.0  ;;  %v812_v35 = vadd.f32 %v811_v0, %v688_v56  ;;  %vm815_vm11 = vcmp.gt.f32.partialorder %v808_v60, 0.0 }
 0x4da   :  { %v822_v2 = vmul.f32 1.442695, %v818_v62  ;;  %v820_v3 = vmin.f32 %v810_v63, 0.0  ;;  %vm816_vm10 = vcmp.gt.f32.partialorder %v810_v63, 0.0 }
 0x4db   :  { %v824_v4 = vmul.f32 1.442695, %v819_v1  ;;  %v821_v5 = vmin.f32 %v812_v35, 0.0  ;;  %vm817_vm12 = vcmp.gt.f32.partialorder %v812_v35, 0.0 }
 0x4dc   :  { %1384 = vpow2.f32 %v822_v2  ;;  %v826_v6 = vmul.f32 1.442695, %v820_v3 }
 0x4dd   :  { %1386 = vpow2.f32 %v824_v4  ;;  %v828_v38 = vmul.f32 1.442695, %v821_v5 }
 0x4de   :  { %1388 = vpow2.f32 %v826_v6 }
 0x4df   :  { %1390 = vpow2.f32 %v828_v38 }
 0x4e6   :  { %v1385_v37 = vpop.eup %1384 }
 0x4e7   :  { %v1387_v40 = vpop.eup %1386  ;;  %v1135_v7 = vadd.f32 -1.0, %v1385_v37 }
 0x4e8   :  { %v1389_v8 = vpop.eup %1388  ;;  %v1136_v9 = vadd.f32 -1.0, %v1387_v40 }
 0x4e9   :  { %v1391_v10 = vpop.eup %1390  ;;  %v834_v11 = vmul.f32 0.8, %v1135_v7  ;;  %v1137_v12 = vadd.f32 -1.0, %v1389_v8 }
 0x4ea   :  { %v835_v13 = vmul.f32 0.8, %v1136_v9  ;;  %v1138_v14 = vadd.f32 -1.0, %v1391_v10 }
 0x4eb   :  { %v836_v15 = vmul.f32 0.8, %v1137_v12  ;;  %v838_v17 = vsel %vm814_vm9, %v806_v58, %v834_v11 }
 0x4ec   :  { %v837_v16 = vmul.f32 0.8, %v1138_v14  ;;  %v839_v20 = vsel %vm815_vm11, %v808_v60, %v835_v13 }
 0x4ed   :  { %v840_v18 = vsel %vm816_vm10, %v810_v63, %v836_v15 }
 0x4ee   :  { %v874_v19 = vpack.c.bf16 %v840_v18, %v838_v17  ;;  %v841_v21 = vsel %vm817_vm12, %v812_v35, %v837_v16 }
 0x4ef   :  { %v875_v22 = vpack.c.bf16 %v841_v21, %v839_v20 }
 0x4f1   :  { %1005 = vmatprep.mubr.bf16.mxu1 %v875_v22 }
 0x4f2   :  { %1006 = vmatmul.mubr.bf16.vlgmr.msra.gmra.mrb[8].mxu1 %v874_v19 }
 0x4f3   :  { %1477 = shalt.err (!%p1474_p0)
}
 0x4f4   :  { %s1478_s7 = scalar_lea.hbm %s1659_s3, 256 }
 0x4f5   :  { %p1479_p1 = scmp.ne.s32.totalorder %s1659_s3, %s1478_s7  ;;  %p1482_p2 = scmp.lt.u32.totalorder %s1478_s7, %s1659_s3 }
 0x4f7   :  { %p1484_p3 = pnand %p1482_p2, %p1479_p1 }
 0x4f9   :  { %1487 = shalt.err (!%p1484_p3)
}
 0x4fa   :  { %1039 = dma.vmem_to_hbm [thread:$0]  %s1034_s29, 256, %s1659_s3, [#allocation4], %s1519_s25, %s1519_s25, %s1520_s26   ;;  %v876_v24 = vld [vmem:[#allocation7 + $0x5] ss:$0 sm:$0xff] }
 0x4fb   :  { %s1529_s3 = smov [#allocation9]  }
 0x4fc   :  { %s1045_s13 = sshll.u32 %s1529_s3, 4  ;;  %s1046_s13 = int_to_ptr.vmem [resolvable:$true] %s1045_s13 }
 0x4fd   :  { %s1488_s14 = scalar_lea.vmem %s1046_s13, 256  ;;  %p1493_p5 = scmp.lt.s32.totalorder %s1046_s13, %s1046_s13 }
 0x4fe   :  { %p1489_p4 = scmp.ne.s32.totalorder %s1046_s13, %s1488_s14  ;;  %p1494_p6 = scmp.lt.s32.totalorder %s1488_s14, %s1488_s14 }
 0x500   :  { %p1495_p7 = por %p1494_p6, %p1493_p5 }
 0x502   :  { %p1496_p8 = pnand %p1495_p7, %p1489_p4 }
 0x5c5   :  { %v1213_v23 = vpop.f32.mrb[8].mxu1 }
 0x5c6   :  { %v1214_v25 = vpop.f32.mrb[9].mxu1 }
 0x5c7   :  { %v1215_v26 = vadd.f32 %v1214_v25, %v1213_v23  ;;  %v1216_v27 = vpop.f32.mrb[10].mxu1 }
 0x5c8   :  { %v1217_v28 = vpop.f32.mrb[11].mxu1 }
 0x5c9   :  { %v1008_v29 = vadd.f32 %v1215_v26, %v876_v24  ;;  %v1218_v30 = vadd.f32 %v1217_v28, %v1216_v27 }
 0x5cb   :  { %v1155_v31 = vmul.f32 -1.442695, %v1008_v29  ;;  %v1011_v32 = vadd.f32 %v1218_v30, %v876_v24 }
 0x5cd   :  { %1392 = vpow2.f32 %v1155_v31  ;;  %v1156_v33 = vmul.f32 -1.442695, %v1011_v32 }
 0x5cf   :  { %1394 = vpow2.f32 %v1156_v33 }
 0x5d7   :  { %v1393_v34 = vpop.eup %1392 }
 0x5d8   :  { %v1020_v36 = vadd.f32 1.0, %v1393_v34 }
 0x5d9   :  { %v1395_v39 = vpop.eup %1394 }
 0x5da   :  { %1396 = vrcp.f32 %v1020_v36  ;;  %v1021_v41 = vadd.f32 1.0, %v1395_v39 }
 0x5dc   :  { %1398 = vrcp.f32 %v1021_v41 }
 0x5e4   :  { %v1397_v42 = vpop.eup %1396 }
 0x5e5   :  { %1026 = vst [vmem:[#allocation9] sm:$0xff] %v1397_v42 }
 0x5e6   :  { %v1399_v43 = vpop.eup %1398 }
 0x5e7   :  { %1027 = vst [vmem:[#allocation9 + $0x8] sm:$0xff] %v1399_v43 }
 0x5e8   :  { %1499 = shalt.err (!%p1496_p8)
}
 0x5e9   :  { %s1500_s17 = scalar_lea.hbm %s1660_s4, 256 }
 0x5ea   :  { %p1501_p9 = scmp.ne.s32.totalorder %s1660_s4, %s1500_s17  ;;  %p1504_p10 = scmp.lt.u32.totalorder %s1500_s17, %s1660_s4 }
 0x5ec   :  { %p1506_p11 = pnand %p1504_p10, %p1501_p9 }
 0x5ee   :  { %1509 = shalt.err (!%p1506_p11)
}
 0x5ef   :  { %1051 = dma.vmem_to_hbm [thread:$0]  %s1046_s13, 256, %s1660_s4, [#allocation10], %s1519_s25, %s1519_s25, %s1520_s26  }
 0x5f0   :  { %1514 = dma.done.wait [#allocation4], 256  }
 0x5f1   :  { %1515 = vsyncadd [#allocation4], 4294967040 }
 0x5f2   :  { %1516 = dma.done.wait [#allocation10], 256  }
 0x5f3   :  { %1517 = vsyncadd [#allocation10], 4294967040 }
 0x5f4   :  { %1058 = vsyncpa [#allocation3], 1 }
 0x5f5   :  { %1059 = vsyncpa [#allocation6], 1 }
 0x5f6   :  { %1060 = vsyncpa [#allocation4], 1 }
 0x5f7   :  { %1061 = vsyncpa [#allocation10], 1 }

// kernel: tpu_custom_call.1
= control target key start
LH: loop header
LB: loop body
LE: loop exit
PB: predicated region body
PF: predicated region fallthrough
CT: control target
= control target key end

     0   :  { %10 = vsyncpa [#allocation3], 0  ;;  %s1656_s0 = inlined_call_operand.hbm [shape: bf16[16,128], index: 0, kind: input, shape index: {}]   ;;  %s1657_s1 = inlined_call_operand.hbm [shape: bf16[1024,256], index: 1, kind: input, shape index: {}]   ;;  %s1658_s2 = inlined_call_operand.hbm [shape: f32[8,256], index: 2, kind: input, shape index: {}]   ;;  %s1659_s3 = inlined_call_operand.hbm [shape: f32[16,128], index: 3, kind: output, shape index: {0}]   ;;  %s1660_s4 = inlined_call_operand.hbm [shape: f32[16,128], index: 4, kind: output, shape index: {1}]  }
   0x1   :  { %11 = vsyncpa [#allocation6], 0 }
   0x2   :  { %12 = vsyncpa [#allocation4], 0 }
   0x3   :  { %13 = vsyncpa [#allocation10], 0  ;;  %s1518_s15 = smov [#allocation5]   ;;  %s1400_s19 = scalar_lea.hbm %s1657_s1, 16384 }
   0x4   :  { %s31_s16 = sshll.u32 %s1518_s15, 4  ;;  %p1401_p0 = scmp.ne.s32.totalorder %s1657_s1, %s1400_s19  ;;  %s32_s16 = int_to_ptr.vmem [resolvable:$true] %s31_s16 }
   0x5   :  { %p1404_p1 = scmp.lt.u32.totalorder %s1400_s19, %s1657_s1 }
   0x7   :  { %p1406_p2 = pnand %p1404_p1, %p1401_p0 }
   0x9   :  { %1409 = shalt.err (!%p1406_p2)
}
   0xa   :  { %s1410_s24 = scalar_lea.vmem %s32_s16, 16384  ;;  %p1415_p4 = scmp.lt.s32.totalorder %s32_s16, %s32_s16 }
   0xb   :  { %p1411_p3 = scmp.ne.s32.totalorder %s32_s16, %s1410_s24  ;;  %p1416_p5 = scmp.lt.s32.totalorder %s1410_s24, %s1410_s24 }
   0xd   :  { %p1417_p6 = por %p1416_p5, %p1415_p4 }
   0xf   :  { %p1418_p7 = pnand %p1417_p6, %p1411_p3 }
  0x11   :  { %1421 = shalt.err (!%p1418_p7)
}
  0x12   :  { %s1519_s25 = smov 128   ;;  %s1520_s26 = smov 8  }
  0x13   :  { %37 = dma.hbm_to_vmem [thread:$0]  %s1657_s1, 16384, %s32_s16, [#allocation6], %s1519_s25, %s1519_s25, %s1520_s26  }
  0x14   :  { %s1521_s29 = smov [#allocation2]   ;;  %s1422_s7 = scalar_lea.hbm %s1656_s0, 128 }
  0x15   :  { %s19_s30 = sshll.u32 %s1521_s29, 4  ;;  %p1423_p8 = scmp.ne.s32.totalorder %s1656_s0, %s1422_s7  ;;  %s20_s30 = int_to_ptr.vmem [resolvable:$true] %s19_s30 }
  0x16   :  { %p1426_p9 = scmp.lt.u32.totalorder %s1422_s7, %s1656_s0 }
  0x18   :  { %p1428_p10 = pnand %p1426_p9, %p1423_p8 }
  0x1a   :  { %1431 = shalt.err (!%p1428_p10)
}
  0x1b   :  { %s1432_s12 = scalar_lea.vmem %s20_s30, 128  ;;  %p1437_p12 = scmp.lt.s32.totalorder %s20_s30, %s20_s30 }
  0x1c   :  { %p1433_p11 = scmp.ne.s32.totalorder %s20_s30, %s1432_s12  ;;  %p1438_p13 = scmp.lt.s32.totalorder %s1432_s12, %s1432_s12 }
  0x1e   :  { %p1439_p0 = por %p1438_p13, %p1437_p12 }
  0x20   :  { %p1440_p1 = pnand %p1439_p0, %p1433_p11 }
  0x22   :  { %1443 = shalt.err (!%p1440_p1)
}
  0x23   :  { %s1522_s1 = smov 64   ;;  %s1523_s13 = smov 4  }
  0x24   :  { %25 = dma.hbm_to_vmem [thread:$0]  %s1656_s0, 128, %s20_s30, [#allocation3], %s1522_s1, %s1522_s1, %s1523_s13  }
  0x25   :  { %s1524_s16 = smov [#allocation7]   ;;  %s1444_s20 = scalar_lea.hbm %s1658_s2, 256 }
  0x26   :  { %s44_s17 = sshll.u32 %s1524_s16, 4  ;;  %p1445_p2 = scmp.ne.s32.totalorder %s1658_s2, %s1444_s20  ;;  %s45_s17 = int_to_ptr.vmem [resolvable:$true] %s44_s17 }
  0x27   :  { %p1448_p3 = scmp.lt.u32.totalorder %s1444_s20, %s1658_s2 }
  0x29   :  { %p1450_p4 = pnand %p1448_p3, %p1445_p2 }
  0x2b   :  { %1453 = shalt.err (!%p1450_p4)
}
  0x2c   :  { %s1454_s27 = scalar_lea.vmem %s45_s17, 256  ;;  %p1459_p6 = scmp.lt.s32.totalorder %s45_s17, %s45_s17 }
  0x2d   :  { %p1455_p5 = scmp.ne.s32.totalorder %s45_s17, %s1454_s27  ;;  %p1460_p7 = scmp.lt.s32.totalorder %s1454_s27, %s1454_s27 }
  0x2f   :  { %p1461_p8 = por %p1460_p7, %p1459_p6 }
  0x31   :  { %p1462_p9 = pnand %p1461_p8, %p1455_p5 }
  0x33   :  { %1465 = shalt.err (!%p1462_p9)
}
  0x34   :  { %47 = dma.hbm_to_vmem [thread:$0]  %s1658_s2, 256, %s45_s17, [#allocation6]  }
  0x35   :  { %1510 = dma.done.wait [#allocation3], 128  }
  0x36   :  { %1511 = vsyncadd [#allocation3], 4294967168 }
  0x37   :  { %1512 = dma.done.wait [#allocation6], 16640  }
  0x38   :  { %1513 = vsyncadd [#allocation6], 4294950656  ;;  %v1525_v0 = vmov 0   ;;  %v1271_v1 = vld [vmem:[#allocation5 + $0x4] ss:$8 sps:$4 sm:$0xff]   ;;  %v1295_v19 = vld [vmem:[#allocation2] sm:$0xff]   ;;  %v78_v36 = vlaneseq }
  0x39   :  { %206 = vmatprep.mubr.bf16.mxu0 %v1525_v0  ;;  %v1273_v2 = vld [vmem:[#allocation5] ss:$8 sps:$4 sm:$0xff]   ;;  %174 = vmatprep.subr.bf16.mxu0 %v1271_v1  ;;  %v1274_v3 = vld [vmem:[#allocation5 + $0x14] ss:$8 sps:$4 sm:$0xff]   ;;  %v1276_v4 = vld [vmem:[#allocation5 + $0x10] ss:$8 sps:$4 sm:$0xff]  }
  0x3a   :  { %175 = vmatpush1.bf16.msra.mxu0 %v1273_v2  ;;  %v1277_v5 = vld [vmem:[#allocation5 + $0x24] ss:$8 sps:$4 sm:$0xff]   ;;  %v1279_v6 = vld [vmem:[#allocation5 + $0x20] ss:$8 sps:$4 sm:$0xff]   ;;  %v1280_v7 = vld [vmem:[#allocation5 + $0x34] ss:$8 sps:$4 sm:$0xff]  }
  0x3b   :  { %176 = vmatprep.subr.bf16.mxu0 %v1274_v3  ;;  %v1282_v8 = vld [vmem:[#allocation5 + $0x30] ss:$8 sps:$4 sm:$0xff]   ;;  %v1283_v9 = vld [vmem:[#allocation5 + $0x44] ss:$8 sps:$4 sm:$0xff]   ;;  %v1296_v10 = vld [vmem:[#allocation5 + $0x100] ss:$8 sps:$4 sm:$0xff]  }
  0x3c   :  { %v1285_v11 = vld [vmem:[#allocation5 + $0x40] ss:$8 sps:$4 sm:$0xff]   ;;  %v1286_v13 = vld [vmem:[#allocation5 + $0x54] ss:$8 sps:$4 sm:$0xff]   ;;  %1157 = vmatprep.subr.bf16.mxu1 %v1296_v10  ;;  %v1288_v14 = vld [vmem:[#allocation5 + $0x50] ss:$8 sps:$4 sm:$0xff]  }
  0x3d   :  { %v1297_v12 = vld [vmem:[#allocation5 + $0x80] ss:$8 sps:$4 sm:$0xff]   ;;  %v1289_v15 = vld [vmem:[#allocation5 + $0x64] ss:$8 sps:$4 sm:$0xff]   ;;  %v1292_v17 = vld [vmem:[#allocation5 + $0x74] ss:$8 sps:$4 sm:$0xff]  }
  0x3e   :  { %177 = vmatpush1.bf16.msra.mxu0 %v1276_v4  ;;  %1158 = vmatpush3.bf16.msra.mxu1 %v1297_v12  ;;  %v1291_v16 = vld [vmem:[#allocation5 + $0x60] ss:$8 sps:$4 sm:$0xff]   ;;  %v1294_v18 = vld [vmem:[#allocation5 + $0x70] ss:$8 sps:$4 sm:$0xff]   ;;  %v1526_v35 = vmov 0.0   ;;  %v1598_v37 = vshrl.u32 %v78_v36, 7 }
  0x3f   :  { %178 = vmatprep.subr.bf16.mxu0 %v1277_v5  ;;  %v1298_v20 = vld [vmem:[#allocation5 + $0x110] ss:$8 sps:$4 sm:$0xff]   ;;  %v1300_v22 = vld [vmem:[#allocation5 + $0x120] ss:$8 sps:$4 sm:$0xff]   ;;  %vm1527_vm4 = vmmov 0   ;;  %s1528_s2 = smov [#allocation8]  }
  0x40   :  { %v1299_v21 = vld [vmem:[#allocation5 + $0x90] ss:$8 sps:$4 sm:$0xff]   ;;  %1159 = vmatprep.subr.bf16.mxu1 %v1298_v20  ;;  %v1301_v23 = vld [vmem:[#allocation5 + $0xa0] ss:$8 sps:$4 sm:$0xff]   ;;  %v80_v38 = vsub.s32 0, %v1598_v37  ;;  %v84_v40 = vsub.s32 1, %v1598_v37 }
  0x41   :  { %v1302_v24 = vld [vmem:[#allocation5 + $0x130] ss:$8 sps:$4 sm:$0xff]   ;;  %v1304_v26 = vld [vmem:[#allocation5 + $0x140] ss:$8 sps:$4 sm:$0xff]   ;;  %s1033_s29 = sshll.u32 %s1528_s2, 4  ;;  %s1034_s29 = int_to_ptr.vmem [resolvable:$true] %s1033_s29 }
  0x42   :  { %179 = vmatpush1.bf16.msra.mxu0 %v1279_v6  ;;  %1160 = vmatpush3.bf16.msra.mxu1 %v1299_v21  ;;  %v1303_v25 = vld [vmem:[#allocation5 + $0xb0] ss:$8 sps:$4 sm:$0xff]   ;;  %v1305_v27 = vld [vmem:[#allocation5 + $0xc0] ss:$8 sps:$4 sm:$0xff]   ;;  %s1466_s30 = scalar_lea.vmem %s1034_s29, 256  ;;  %p1471_p11 = scmp.lt.s32.totalorder %s1034_s29, %s1034_s29 }
  0x43   :  { %180 = vmatprep.subr.bf16.mxu0 %v1280_v7  ;;  %1161 = vmatprep.subr.bf16.mxu1 %v1300_v22  ;;  %v1306_v28 = vld [vmem:[#allocation5 + $0x150] ss:$8 sps:$4 sm:$0xff]   ;;  %v1308_v30 = vld [vmem:[#allocation5 + $0x160] ss:$8 sps:$4 sm:$0xff]   ;;  %p1467_p10 = scmp.ne.s32.totalorder %s1034_s29, %s1466_s30  ;;  %p1472_p12 = scmp.lt.s32.totalorder %s1466_s30, %s1466_s30 }
  0x44   :  { %v1307_v29 = vld [vmem:[#allocation5 + $0xd0] ss:$8 sps:$4 sm:$0xff]   ;;  %v1309_v31 = vld [vmem:[#allocation5 + $0xe0] ss:$8 sps:$4 sm:$0xff]  }
  0x45   :  { %v1310_v32 = vld [vmem:[#allocation5 + $0x170] ss:$8 sps:$4 sm:$0xff]   ;;  %v1312_v34 = vld [vmem:[#allocation5 + $0x180] ss:$8 sps:$4 sm:$0xff]   ;;  %p1473_p13 = por %p1472_p12, %p1471_p11 }
  0x46   :  { %181 = vmatpush1.bf16.msra.mxu0 %v1282_v8  ;;  %1162 = vmatpush3.bf16.msra.mxu1 %v1301_v23  ;;  %v1311_v33 = vld [vmem:[#allocation5 + $0xf0] ss:$8 sps:$4 sm:$0xff]   ;;  %v76_v39 = vld [vmem:[#allocation7] ss:$8 sm:$0x3] }
  0x47   :  { %182 = vmatprep.subr.bf16.mxu0 %v1283_v9  ;;  %1163 = vmatprep.subr.bf16.mxu1 %v1302_v24  ;;  %v81_v41 = vrot.slane %v76_v39, %v80_v38  ;;  %v85_v42 = vrot.slane %v76_v39, %v84_v40  ;;  %v1319_v20 = vld [vmem:[#allocation5 + $0x1f0] ss:$8 sps:$4 sm:$0xff]   ;;  %v1320_v21 = vld [vmem:[#allocation5 + $0x200] ss:$8 sps:$4 sm:$0xff]   ;;  %p1474_p0 = pnand %p1473_p13, %p1467_p10 }
  0x48   :  { %v1321_v22 = vld [vmem:[#allocation5 + $0x210] ss:$8 sps:$4 sm:$0xff]   ;;  %v1322_v23 = vld [vmem:[#allocation5 + $0x220] ss:$8 sps:$4 sm:$0xff]  }
  0x49   :  { %v1323_v24 = vld [vmem:[#allocation5 + $0x230] ss:$8 sps:$4 sm:$0xff]  }
  0x4a   :  { %183 = vmatpush1.bf16.msra.mxu0 %v1285_v11  ;;  %1164 = vmatpush3.bf16.msra.mxu1 %v1303_v25  ;;  %v1324_v25 = vld [vmem:[#allocation5 + $0x240] ss:$8 sps:$4 sm:$0xff]  }
  0x4b   :  { %184 = vmatprep.subr.bf16.mxu0 %v1286_v13  ;;  %1165 = vmatprep.subr.bf16.mxu1 %v1304_v26  ;;  %v1325_v26 = vld [vmem:[#allocation5 + $0x250] ss:$8 sps:$4 sm:$0xff]  }
  0x4e   :  { %185 = vmatpush1.bf16.msra.mxu0 %v1288_v14  ;;  %1166 = vmatpush3.bf16.msra.mxu1 %v1305_v27  ;;  %v1313_v14 = vld [vmem:[#allocation5 + $0x190] ss:$8 sps:$4 sm:$0xff]  }
  0x4f   :  { %186 = vmatprep.subr.bf16.mxu0 %v1289_v15  ;;  %1167 = vmatprep.subr.bf16.mxu1 %v1306_v28  ;;  %v1314_v15 = vld [vmem:[#allocation5 + $0x1a0] ss:$8 sps:$4 sm:$0xff]  }
  0x50   :  { %v279_v28 = vld [vmem:[#allocation7 + $0x1] ss:$0 sm:$0xff] }
  0x52   :  { %187 = vmatpush1.bf16.msra.mxu0 %v1291_v16  ;;  %1168 = vmatpush3.bf16.msra.mxu1 %v1307_v29  ;;  %v1315_v16 = vld [vmem:[#allocation5 + $0x1b0] ss:$8 sps:$4 sm:$0xff]  }
  0x53   :  { %188 = vmatprep.subr.bf16.mxu0 %v1292_v17  ;;  %1169 = vmatprep.subr.bf16.mxu1 %v1308_v30  ;;  %v1316_v17 = vld [vmem:[#allocation5 + $0x1c0] ss:$8 sps:$4 sm:$0xff]  }
  0x56   :  { %189 = vmatpush1.bf16.msra.mxu0 %v1294_v18  ;;  %1170 = vmatpush3.bf16.msra.mxu1 %v1309_v31  ;;  %v1317_v18 = vld [vmem:[#allocation5 + $0x1d0] ss:$8 sps:$4 sm:$0xff]  }
  0x57   :  { %1171 = vmatprep.subr.bf16.mxu1 %v1310_v32  ;;  %1219 = vmatprep.subr.bf16.mxu0 %v1526_v35 }
  0x59   :  { %207 = vmatmul.mubr.bf16.vlgmr.msra.gmra.mrb[0].mxu0 %v1295_v19  ;;  %v1318_v19 = vld [vmem:[#allocation5 + $0x1e0] ss:$8 sps:$4 sm:$0xff]  }
  0x5a   :  { %1172 = vmatpush3.bf16.msra.mxu1 %v1311_v33  ;;  %1220 = vmatpush3.bf16.msra.mxu0 %v1312_v34 }
  0x5b   :  { %1239 = vmatprep.subr.bf16.mxu1 %v1526_v35  ;;  %1221 = vmatprep.subr.bf16.mxu0 %v1526_v35 }
  0x5c   :  { %1235 = vmatprep.mubr.msk.bf16.mxu0 %vm1527_vm4, %v1526_v35 }
  0x5e   :  { %1222 = vmatpush3.bf16.msra.mxu0 %v1313_v14  ;;  %v1352_v14 = vld [vmem:[#allocation5 + $0x380] ss:$8 sps:$4 sm:$0xff]  }
  0x5f   :  { %1223 = vmatprep.subr.bf16.mxu0 %v1526_v35 }
  0x62   :  { %1224 = vmatpush3.bf16.msra.mxu0 %v1314_v15  ;;  %v1353_v15 = vld [vmem:[#allocation5 + $0x300] ss:$8 sps:$4 sm:$0xff]  }
  0x63   :  { %1225 = vmatprep.subr.bf16.mxu0 %v1526_v35 }
  0x66   :  { %1226 = vmatpush3.bf16.msra.mxu0 %v1315_v16  ;;  %v557_v16 = vld [vmem:[#allocation7 + $0x3] ss:$0 sm:$0xff] }
  0x67   :  { %1227 = vmatprep.subr.bf16.mxu0 %v1526_v35 }
  0x6a   :  { %1228 = vmatpush3.bf16.msra.mxu0 %v1316_v17 }
  0x6b   :  { %1229 = vmatprep.subr.bf16.mxu0 %v1526_v35 }
  0x6e   :  { %1230 = vmatpush3.bf16.msra.mxu0 %v1317_v18 }
  0x6f   :  { %1231 = vmatprep.subr.bf16.mxu0 %v1526_v35 }
  0x72   :  { %1232 = vmatpush3.bf16.msra.mxu0 %v1318_v19 }
  0x73   :  { %1233 = vmatprep.subr.bf16.mxu0 %v1526_v35 }
  0x76   :  { %1234 = vmatpush3.bf16.msra.mxu0 %v1319_v20 }
 0x12c   :  { %v208_v43 = vpop.f32.mrb[0].mxu0 }
 0x12d   :  { %v209_v44 = vadd.f32 %v208_v43, %v81_v41  ;;  %v210_v45 = vpop.f32.mrb[1].mxu0 }
 0x12e   :  { %v211_v46 = vadd.f32 %v210_v45, %v85_v42  ;;  %v212_v47 = vpop.f32.mrb[2].mxu0 }
 0x12f   :  { %v221_v48 = vmin.f32 %v209_v44, 0.0  ;;  %v213_v49 = vadd.f32 %v212_v47, %v81_v41  ;;  %v214_v50 = vpop.f32.mrb[3].mxu0  ;;  %vm217_vm0 = vcmp.gt.f32.partialorder %v209_v44, 0.0 }
 0x130   :  { %v222_v51 = vmin.f32 %v211_v46, 0.0  ;;  %v215_v52 = vadd.f32 %v214_v50, %v85_v42  ;;  %vm218_vm2 = vcmp.gt.f32.partialorder %v211_v46, 0.0 }
 0x131   :  { %v225_v53 = vmul.f32 1.442695, %v221_v48  ;;  %v223_v54 = vmin.f32 %v213_v49, 0.0  ;;  %vm219_vm1 = vcmp.gt.f32.partialorder %v213_v49, 0.0 }
 0x132   :  { %v227_v55 = vmul.f32 1.442695, %v222_v51  ;;  %v224_v56 = vmin.f32 %v215_v52, 0.0  ;;  %vm220_vm3 = vcmp.gt.f32.partialorder %v215_v52, 0.0 }
 0x133   :  { %1368 = vpow2.f32 %v225_v53  ;;  %v229_v57 = vmul.f32 1.442695, %v223_v54  ;;  %v1326_v53 = vld [vmem:[#allocation5 + $0x260] ss:$8 sps:$4 sm:$0xff]   ;;  %v1327_v54 = vld [vmem:[#allocation5 + $0x270] ss:$8 sps:$4 sm:$0xff]  }
 0x134   :  { %1370 = vpow2.f32 %v227_v55  ;;  %v231_v58 = vmul.f32 1.442695, %v224_v56  ;;  %v1328_v55 = vld [vmem:[#allocation5 + $0x280] ss:$8 sps:$4 sm:$0xff]   ;;  %v1330_v56 = vld [vmem:[#allocation5 + $0x284] ss:$8 sps:$4 sm:$0xff]  }
 0x135   :  { %1372 = vpow2.f32 %v229_v57  ;;  %v1333_v57 = vld [vmem:[#allocation5 + $0x294] ss:$8 sps:$4 sm:$0xff]   ;;  %771 = vmatprep.subr.bf16.mxu0 %v1330_v56 }
 0x136   :  { %1374 = vpow2.f32 %v231_v58  ;;  %v1331_v58 = vld [vmem:[#allocation5 + $0x290] ss:$8 sps:$4 sm:$0xff]  }
 0x13d   :  { %v1369_v59 = vpop.eup %1368 }
 0x13e   :  { %v1371_v60 = vpop.eup %1370  ;;  %v1079_v61 = vadd.f32 -1.0, %v1369_v59  ;;  %v448_v59 = vld [vmem:[#allocation7 + $0x2] ss:$0 sm:$0xff] }
 0x13f   :  { %v1373_v62 = vpop.eup %1372  ;;  %v1080_v63 = vadd.f32 -1.0, %v1371_v60 }
 0x140   :  { %v1375_v1 = vpop.eup %1374  ;;  %v237_v2 = vmul.f32 0.8, %v1079_v61  ;;  %v1081_v3 = vadd.f32 -1.0, %v1373_v62 }
 0x141   :  { %v1082_v4 = vadd.f32 -1.0, %v1375_v1  ;;  %v238_v5 = vmul.f32 0.8, %v1080_v63 }
 0x142   :  { %v239_v6 = vmul.f32 0.8, %v1081_v3  ;;  %v241_v8 = vsel %vm217_vm0, %v209_v44, %v237_v2  ;;  %v1336_v2 = vld [vmem:[#allocation5 + $0x2a4] ss:$8 sps:$4 sm:$0xff]   ;;  %v1334_v3 = vld [vmem:[#allocation5 + $0x2a0] ss:$8 sps:$4 sm:$0xff]  }
 0x143   :  { %v240_v7 = vmul.f32 0.8, %v1082_v4  ;;  %v242_v10 = vsel %vm218_vm2, %v211_v46, %v238_v5  ;;  %v1339_v4 = vld [vmem:[#allocation5 + $0x2b4] ss:$8 sps:$4 sm:$0xff]   ;;  %v1337_v5 = vld [vmem:[#allocation5 + $0x2b0] ss:$8 sps:$4 sm:$0xff]  }
 0x144   :  { %v243_v9 = vsel %vm219_vm1, %v213_v49, %v239_v6  ;;  %v1342_v6 = vld [vmem:[#allocation5 + $0x2c4] ss:$8 sps:$4 sm:$0xff]  }
 0x145   :  { %v244_v11 = vsel %vm220_vm3, %v215_v52, %v240_v7  ;;  %v277_v12 = vpack.c.bf16 %v243_v9, %v241_v8  ;;  %v1340_v7 = vld [vmem:[#allocation5 + $0x2c0] ss:$8 sps:$4 sm:$0xff]   ;;  %v1345_v8 = vld [vmem:[#allocation5 + $0x2d4] ss:$8 sps:$4 sm:$0xff]   ;;  %v1343_v9 = vld [vmem:[#allocation5 + $0x2d0] ss:$8 sps:$4 sm:$0xff]  }
 0x146   :  { %v278_v13 = vpack.c.bf16 %v244_v11, %v242_v10  ;;  %v1348_v10 = vld [vmem:[#allocation5 + $0x2e4] ss:$8 sps:$4 sm:$0xff]   ;;  %v1346_v11 = vld [vmem:[#allocation5 + $0x2e0] ss:$8 sps:$4 sm:$0xff]  }
 0x148   :  { %408 = vmatprep.mubr.bf16.mxu1 %v278_v13  ;;  %v1349_v13 = vld [vmem:[#allocation5 + $0x2f0] ss:$8 sps:$4 sm:$0xff]  }
 0x149   :  { %409 = vmatmul.mubr.bf16.vlgmr.msra.gmra.mrb[0].mxu1 %v277_v12  ;;  %v1351_v12 = vld [vmem:[#allocation5 + $0x2f4] ss:$8 sps:$4 sm:$0xff]  }
 0x14a   :  { %1255 = vmatprep.mubr.msk.bf16.mxu1 %vm1527_vm4, %v1526_v35  ;;  %1240 = vmatpush3.bf16.msra.mxu1 %v1320_v21 }
 0x14b   :  { %1241 = vmatprep.subr.bf16.mxu1 %v1526_v35 }
 0x14e   :  { %1242 = vmatpush3.bf16.msra.mxu1 %v1321_v22 }
 0x14f   :  { %1243 = vmatprep.subr.bf16.mxu1 %v1526_v35 }
 0x152   :  { %1244 = vmatpush3.bf16.msra.mxu1 %v1322_v23 }
 0x153   :  { %1245 = vmatprep.subr.bf16.mxu1 %v1526_v35 }
 0x156   :  { %1246 = vmatpush3.bf16.msra.mxu1 %v1323_v24 }
 0x157   :  { %1247 = vmatprep.subr.bf16.mxu1 %v1526_v35 }
 0x15a   :  { %1248 = vmatpush3.bf16.msra.mxu1 %v1324_v25 }
 0x15b   :  { %1249 = vmatprep.subr.bf16.mxu1 %v1526_v35 }
 0x15e   :  { %1250 = vmatpush3.bf16.msra.mxu1 %v1325_v26 }
 0x15f   :  { %1251 = vmatprep.subr.bf16.mxu1 %v1526_v35 }
 0x162   :  { %1252 = vmatpush3.bf16.msra.mxu1 %v1326_v53  ;;  %v1367_v53 = vld [vmem:[#allocation5 + $0x370] ss:$8 sps:$4 sm:$0xff]  }
 0x163   :  { %1253 = vmatprep.subr.bf16.mxu1 %v1526_v35 }
 0x166   :  { %1254 = vmatpush3.bf16.msra.mxu1 %v1327_v54  ;;  %v679_v54 = vld [vmem:[#allocation7 + $0x4] ss:$8 sm:$0x3] }
 0x167   :  { %1197 = vmatprep.subr.bf16.mxu1 %v1352_v14  ;;  %v688_v56 = vrot.slane %v679_v54, %v84_v40 }
 0x21c   :  { %v1173_v27 = vpop.f32.mrb[0].mxu1 }
 0x21d   :  { %v1174_v29 = vpop.f32.mrb[1].mxu1 }
 0x21e   :  { %v1175_v30 = vadd.f32 %v1174_v29, %v1173_v27  ;;  %v1176_v31 = vpop.f32.mrb[2].mxu1 }
 0x21f   :  { %v1177_v32 = vpop.f32.mrb[3].mxu1 }
 0x220   :  { %v411_v33 = vadd.f32 %v1175_v30, %v279_v28  ;;  %v1178_v34 = vadd.f32 %v1177_v32, %v1176_v31 }
 0x222   :  { %v419_v36 = vmin.f32 %v411_v33, 0.0  ;;  %v414_v39 = vadd.f32 %v1178_v34, %v279_v28  ;;  %vm417_vm5 = vcmp.gt.f32.partialorder %v411_v33, 0.0 }
 0x224   :  { %v421_v41 = vmul.f32 1.442695, %v419_v36  ;;  %v420_v42 = vmin.f32 %v414_v39, 0.0  ;;  %vm418_vm6 = vcmp.gt.f32.partialorder %v414_v39, 0.0 }
 0x226   :  { %1376 = vpow2.f32 %v421_v41  ;;  %v423_v43 = vmul.f32 1.442695, %v420_v42  ;;  %v1355_v41 = vld [vmem:[#allocation5 + $0x310] ss:$8 sps:$4 sm:$0xff]   ;;  %v1356_v42 = vld [vmem:[#allocation5 + $0x3a0] ss:$8 sps:$4 sm:$0xff]  }
 0x228   :  { %1378 = vpow2.f32 %v423_v43  ;;  %v1357_v43 = vld [vmem:[#allocation5 + $0x320] ss:$8 sps:$4 sm:$0xff]  }
 0x230   :  { %v1377_v44 = vpop.eup %1376 }
 0x231   :  { %v1099_v45 = vadd.f32 -1.0, %v1377_v44  ;;  %v1358_v44 = vld [vmem:[#allocation5 + $0x3b0] ss:$8 sps:$4 sm:$0xff]  }
 0x232   :  { %v1379_v46 = vpop.eup %1378 }
 0x233   :  { %v427_v47 = vmul.f32 0.8, %v1099_v45  ;;  %v1100_v48 = vadd.f32 -1.0, %v1379_v46  ;;  %v1359_v45 = vld [vmem:[#allocation5 + $0x330] ss:$8 sps:$4 sm:$0xff]  }
 0x234   :  { %v1360_v46 = vld [vmem:[#allocation5 + $0x3c0] ss:$8 sps:$4 sm:$0xff]  }
 0x235   :  { %v428_v49 = vmul.f32 0.8, %v1100_v48  ;;  %v429_v50 = vsel %vm417_vm5, %v411_v33, %v427_v47  ;;  %v1361_v47 = vld [vmem:[#allocation5 + $0x340] ss:$8 sps:$4 sm:$0xff]   ;;  %v1362_v48 = vld [vmem:[#allocation5 + $0x3d0] ss:$8 sps:$4 sm:$0xff]  }
 0x237   :  { %v430_v51 = vsel %vm418_vm6, %v414_v39, %v428_v49  ;;  %v1354_v39 = vld [vmem:[#allocation5 + $0x390] ss:$8 sps:$4 sm:$0xff]  }
 0x238   :  { %v447_v52 = vpack.c.bf16 %v430_v51, %v429_v50  ;;  %v1363_v49 = vld [vmem:[#allocation5 + $0x350] ss:$8 sps:$4 sm:$0xff]   ;;  %v1364_v50 = vld [vmem:[#allocation5 + $0x3e0] ss:$8 sps:$4 sm:$0xff]  }
 0x239   :  { %v1365_v51 = vld [vmem:[#allocation5 + $0x360] ss:$8 sps:$4 sm:$0xff]  }
 0x23a   :  { %1236 = vmatmul.mubr.bf16.vlgmr.msra.gmra.mrb[4].mxu0 %v447_v52  ;;  %v1366_v52 = vld [vmem:[#allocation5 + $0x3f0] ss:$8 sps:$4 sm:$0xff]  }
 0x23b   :  { %803 = vmatprep.mubr.bf16.mxu0 %v1525_v0  ;;  %772 = vmatpush1.bf16.msra.mxu0 %v1328_v55  ;;  %v684_v55 = vrot.slane %v679_v54, %v80_v38 }
 0x23c   :  { %773 = vmatprep.subr.bf16.mxu0 %v1333_v57 }
 0x23f   :  { %774 = vmatpush1.bf16.msra.mxu0 %v1331_v58 }
 0x240   :  { %775 = vmatprep.subr.bf16.mxu0 %v1336_v2 }
 0x243   :  { %776 = vmatpush1.bf16.msra.mxu0 %v1334_v3 }
 0x244   :  { %777 = vmatprep.subr.bf16.mxu0 %v1339_v4 }
 0x247   :  { %778 = vmatpush1.bf16.msra.mxu0 %v1337_v5 }
 0x248   :  { %779 = vmatprep.subr.bf16.mxu0 %v1342_v6 }
 0x24b   :  { %780 = vmatpush1.bf16.msra.mxu0 %v1340_v7 }
 0x24c   :  { %781 = vmatprep.subr.bf16.mxu0 %v1345_v8 }
 0x24f   :  { %782 = vmatpush1.bf16.msra.mxu0 %v1343_v9 }
 0x250   :  { %783 = vmatprep.subr.bf16.mxu0 %v1348_v10 }
 0x253   :  { %784 = vmatpush1.bf16.msra.mxu0 %v1346_v11 }
 0x254   :  { %785 = vmatprep.subr.bf16.mxu0 %v1351_v12 }
 0x257   :  { %786 = vmatpush1.bf16.msra.mxu0 %v1349_v13 }
 0x30d   :  { %v531_v60 = vpop.f32.mrb[4].mxu0 }
 0x30e   :  { %v532_v61 = vadd.f32 %v531_v60, %v448_v59  ;;  %v1237_v62 = vpop.f32.mrb[5].mxu0 }
 0x30f   :  { %v534_v63 = vpop.f32.mrb[6].mxu0 }
 0x310   :  { %538 = vst [vmem:[#allocation8] sm:$0xff] %v532_v61  ;;  %v535_v0 = vadd.f32 %v534_v63, %v448_v59  ;;  %v1238_v1 = vpop.f32.mrb[7].mxu0 }
 0x312   :  { %539 = vst [vmem:[#allocation8 + $0x8] sm:$0xff] %v535_v0  ;;  %v556_v35 = vpack.c.bf16 %v535_v0, %v532_v61 }
 0x314   :  { %1256 = vmatmul.mubr.bf16.vlgmr.msra.gmra.mrb[4].mxu1 %v556_v35 }
 0x315   :  { %1198 = vmatpush3.bf16.msra.mxu1 %v1353_v15 }
 0x316   :  { %1199 = vmatprep.subr.bf16.mxu1 %v1354_v39 }
 0x319   :  { %1200 = vmatpush3.bf16.msra.mxu1 %v1355_v41 }
 0x31a   :  { %1201 = vmatprep.subr.bf16.mxu1 %v1356_v42 }
 0x31d   :  { %1202 = vmatpush3.bf16.msra.mxu1 %v1357_v43 }
 0x31e   :  { %1203 = vmatprep.subr.bf16.mxu1 %v1358_v44 }
 0x321   :  { %1204 = vmatpush3.bf16.msra.mxu1 %v1359_v45 }
 0x322   :  { %1205 = vmatprep.subr.bf16.mxu1 %v1360_v46 }
 0x325   :  { %1206 = vmatpush3.bf16.msra.mxu1 %v1361_v47 }
 0x326   :  { %1207 = vmatprep.subr.bf16.mxu1 %v1362_v48 }
 0x329   :  { %1208 = vmatpush3.bf16.msra.mxu1 %v1363_v49 }
 0x32a   :  { %1209 = vmatprep.subr.bf16.mxu1 %v1364_v50 }
 0x32d   :  { %1210 = vmatpush3.bf16.msra.mxu1 %v1365_v51 }
 0x32e   :  { %1211 = vmatprep.subr.bf16.mxu1 %v1366_v52 }
 0x331   :  { %1212 = vmatpush3.bf16.msra.mxu1 %v1367_v53 }
 0x3e7   :  { %v640_v17 = vpop.f32.mrb[4].mxu1 }
 0x3e8   :  { %v641_v18 = vadd.f32 %v640_v17, %v557_v16  ;;  %v1257_v19 = vpop.f32.mrb[5].mxu1 }
 0x3e9   :  { %v643_v20 = vpop.f32.mrb[6].mxu1 }
 0x3ea   :  { %v649_v21 = vmin.f32 %v641_v18, 0.0  ;;  %v644_v22 = vadd.f32 %v643_v20, %v557_v16  ;;  %v1258_v23 = vpop.f32.mrb[7].mxu1  ;;  %vm647_vm7 = vcmp.gt.f32.partialorder %v641_v18, 0.0 }
 0x3ec   :  { %v651_v24 = vmul.f32 1.442695, %v649_v21  ;;  %v650_v25 = vmin.f32 %v644_v22, 0.0  ;;  %vm648_vm8 = vcmp.gt.f32.partialorder %v644_v22, 0.0 }
 0x3ee   :  { %1380 = vpow2.f32 %v651_v24  ;;  %v653_v26 = vmul.f32 1.442695, %v650_v25 }
 0x3f0   :  { %1382 = vpow2.f32 %v653_v26 }
 0x3f8   :  { %v1381_v27 = vpop.eup %1380 }
 0x3f9   :  { %v1117_v28 = vadd.f32 -1.0, %v1381_v27 }
 0x3fa   :  { %v1383_v29 = vpop.eup %1382 }
 0x3fb   :  { %v657_v30 = vmul.f32 0.8, %v1117_v28  ;;  %v1118_v31 = vadd.f32 -1.0, %v1383_v29 }
 0x3fd   :  { %v658_v32 = vmul.f32 0.8, %v1118_v31  ;;  %v659_v33 = vsel %vm647_vm7, %v641_v18, %v657_v30 }
 0x3ff   :  { %v660_v34 = vsel %vm648_vm8, %v644_v22, %v658_v32 }
 0x400   :  { %v677_v36 = vpack.c.bf16 %v660_v34, %v659_v33 }
 0x402   :  { %804 = vmatmul.mubr.bf16.vlgmr.msra.gmra.mrb[8].mxu0 %v677_v36 }
 0x4d5   :  { %v805_v57 = vpop.f32.mrb[8].mxu0 }
 0x4d6   :  { %v806_v58 = vadd.f32 %v805_v57, %v684_v55  ;;  %v807_v59 = vpop.f32.mrb[9].mxu0 }
 0x4d7   :  { %v808_v60 = vadd.f32 %v807_v59, %v688_v56  ;;  %v809_v61 = vpop.f32.mrb[10].mxu0 }
 0x4d8   :  { %v818_v62 = vmin.f32 %v806_v58, 0.0  ;;  %v810_v63 = vadd.f32 %v809_v61, %v684_v55  ;;  %v811_v0 = vpop.f32.mrb[11].mxu0  ;;  %vm814_vm9 = vcmp.gt.f32.partialorder %v806_v58, 0.0 }
 0x4d9   :  { %v819_v1 = vmin.f32 %v808_v60, 0.0  ;;  %v812_v35 = vadd.f32 %v811_v0, %v688_v56  ;;  %vm815_vm11 = vcmp.gt.f32.partialorder %v808_v60, 0.0 }
 0x4da   :  { %v822_v2 = vmul.f32 1.442695, %v818_v62  ;;  %v820_v3 = vmin.f32 %v810_v63, 0.0  ;;  %vm816_vm10 = vcmp.gt.f32.partialorder %v810_v63, 0.0 }
 0x4db   :  { %v824_v4 = vmul.f32 1.442695, %v819_v1  ;;  %v821_v5 = vmin.f32 %v812_v35, 0.0  ;;  %vm817_vm12 = vcmp.gt.f32.partialorder %v812_v35, 0.0 }
 0x4dc   :  { %1384 = vpow2.f32 %v822_v2  ;;  %v826_v6 = vmul.f32 1.442695, %v820_v3 }
 0x4dd   :  { %1386 = vpow2.f32 %v824_v4  ;;  %v828_v38 = vmul.f32 1.442695, %v821_v5 }
 0x4de   :  { %1388 = vpow2.f32 %v826_v6 }
 0x4df   :  { %1390 = vpow2.f32 %v828_v38 }
 0x4e6   :  { %v1385_v37 = vpop.eup %1384 }
 0x4e7   :  { %v1387_v40 = vpop.eup %1386  ;;  %v1135_v7 = vadd.f32 -1.0, %v1385_v37 }
 0x4e8   :  { %v1389_v8 = vpop.eup %1388  ;;  %v1136_v9 = vadd.f32 -1.0, %v1387_v40 }
 0x4e9   :  { %v1391_v10 = vpop.eup %1390  ;;  %v834_v11 = vmul.f32 0.8, %v1135_v7  ;;  %v1137_v12 = vadd.f32 -1.0, %v1389_v8 }
 0x4ea   :  { %v835_v13 = vmul.f32 0.8, %v1136_v9  ;;  %v1138_v14 = vadd.f32 -1.0, %v1391_v10 }
 0x4eb   :  { %v836_v15 = vmul.f32 0.8, %v1137_v12  ;;  %v838_v17 = vsel %vm814_vm9, %v806_v58, %v834_v11 }
 0x4ec   :  { %v837_v16 = vmul.f32 0.8, %v1138_v14  ;;  %v839_v20 = vsel %vm815_vm11, %v808_v60, %v835_v13 }
 0x4ed   :  { %v840_v18 = vsel %vm816_vm10, %v810_v63, %v836_v15 }
 0x4ee   :  { %v874_v19 = vpack.c.bf16 %v840_v18, %v838_v17  ;;  %v841_v21 = vsel %vm817_vm12, %v812_v35, %v837_v16 }
 0x4ef   :  { %v875_v22 = vpack.c.bf16 %v841_v21, %v839_v20 }
 0x4f1   :  { %1005 = vmatprep.mubr.bf16.mxu1 %v875_v22 }
 0x4f2   :  { %1006 = vmatmul.mubr.bf16.vlgmr.msra.gmra.mrb[8].mxu1 %v874_v19 }
 0x4f3   :  { %1477 = shalt.err (!%p1474_p0)
}
 0x4f4   :  { %s1478_s7 = scalar_lea.hbm %s1659_s3, 256 }
 0x4f5   :  { %p1479_p1 = scmp.ne.s32.totalorder %s1659_s3, %s1478_s7  ;;  %p1482_p2 = scmp.lt.u32.totalorder %s1478_s7, %s1659_s3 }
 0x4f7   :  { %p1484_p3 = pnand %p1482_p2, %p1479_p1 }
 0x4f9   :  { %1487 = shalt.err (!%p1484_p3)
}
 0x4fa   :  { %1039 = dma.vmem_to_hbm [thread:$0]  %s1034_s29, 256, %s1659_s3, [#allocation4], %s1519_s25, %s1519_s25, %s1520_s26   ;;  %v876_v24 = vld [vmem:[#allocation7 + $0x5] ss:$0 sm:$0xff] }
 0x4fb   :  { %s1529_s3 = smov [#allocation9]  }
 0x4fc   :  { %s1045_s13 = sshll.u32 %s1529_s3, 4  ;;  %s1046_s13 = int_to_ptr.vmem [resolvable:$true] %s1045_s13 }
 0x4fd   :  { %s1488_s14 = scalar_lea.vmem %s1046_s13, 256  ;;  %p1493_p5 = scmp.lt.s32.totalorder %s1046_s13, %s1046_s13 }
 0x4fe   :  { %p1489_p4 = scmp.ne.s32.totalorder %s1046_s13, %s1488_s14  ;;  %p1494_p6 = scmp.lt.s32.totalorder %s1488_s14, %s1488_s14 }
 0x500   :  { %p1495_p7 = por %p1494_p6, %p1493_p5 }
 0x502   :  { %p1496_p8 = pnand %p1495_p7, %p1489_p4 }
 0x5c5   :  { %v1213_v23 = vpop.f32.mrb[8].mxu1 }
 0x5c6   :  { %v1214_v25 = vpop.f32.mrb[9].mxu1 }
 0x5c7   :  { %v1215_v26 = vadd.f32 %v1214_v25, %v1213_v23  ;;  %v1216_v27 = vpop.f32.mrb[10].mxu1 }
 0x5c8   :  { %v1217_v28 = vpop.f32.mrb[11].mxu1 }
 0x5c9   :  { %v1008_v29 = vadd.f32 %v1215_v26, %v876_v24  ;;  %v1218_v30 = vadd.f32 %v1217_v28, %v1216_v27 }
 0x5cb   :  { %v1155_v31 = vmul.f32 -1.442695, %v1008_v29  ;;  %v1011_v32 = vadd.f32 %v1218_v30, %v876_v24 }
 0x5cd   :  { %1392 = vpow2.f32 %v1155_v31  ;;  %v1156_v33 = vmul.f32 -1.442695, %v1011_v32 }
 0x5cf   :  { %1394 = vpow2.f32 %v1156_v33 }
 0x5d7   :  { %v1393_v34 = vpop.eup %1392 }
 0x5d8   :  { %v1020_v36 = vadd.f32 1.0, %v1393_v34 }
 0x5d9   :  { %v1395_v39 = vpop.eup %1394 }
 0x5da   :  { %1396 = vrcp.f32 %v1020_v36  ;;  %v1021_v41 = vadd.f32 1.0, %v1395_v39 }
 0x5dc   :  { %1398 = vrcp.f32 %v1021_v41 }
 0x5e4   :  { %v1397_v42 = vpop.eup %1396 }
 0x5e5   :  { %1026 = vst [vmem:[#allocation9] sm:$0xff] %v1397_v42 }
 0x5e6   :  { %v1399_v43 = vpop.eup %1398 }
 0x5e7   :  { %1027 = vst [vmem:[#allocation9 + $0x8] sm:$0xff] %v1399_v43 }
 0x5e8   :  { %1499 = shalt.err (!%p1496_p8)
}
 0x5e9   :  { %s1500_s17 = scalar_lea.hbm %s1660_s4, 256 }
 0x5ea   :  { %p1501_p9 = scmp.ne.s32.totalorder %s1660_s4, %s1500_s17  ;;  %p1504_p10 = scmp.lt.u32.totalorder %s1500_s17, %s1660_s4 }
 0x5ec   :  { %p1506_p11 = pnand %p1504_p10, %p1501_p9 }
 0x5ee   :  { %1509 = shalt.err (!%p1506_p11)
}
 0x5ef   :  { %1051 = dma.vmem_to_hbm [thread:$0]  %s1046_s13, 256, %s1660_s4, [#allocation10], %s1519_s25, %s1519_s25, %s1520_s26  }
 0x5f0   :  { %1514 = dma.done.wait [#allocation4], 256  }
 0x5f1   :  { %1515 = vsyncadd [#allocation4], 4294967040 }
 0x5f2   :  { %1516 = dma.done.wait [#allocation10], 256  }
 0x5f3   :  { %1517 = vsyncadd [#allocation10], 4294967040 }
 0x5f4   :  { %1058 = vsyncpa [#allocation3], 1 }
 0x5f5   :  { %1059 = vsyncpa [#allocation6], 1 }
 0x5f6   :  { %1060 = vsyncpa [#allocation4], 1 }
 0x5f7   :  { %1061 = vsyncpa [#allocation10], 1 }

</bundles_post_ra>
